<compile_context>
chip_gen: v6e
topology: v6e:2x2x1
jax: 0.10.0
libtpu: 0.0.40
codegen_flags: <defaults>
</compile_context>

<pallas_src>
import functools

import jax
import jax.numpy as jnp
from jax.experimental import pallas as pl
from jax.experimental.pallas import tpu as pltpu


def _round_up(x, m):
    return ((x + m - 1) // m) * m


def _pad2(x, rows, cols):
    return jnp.pad(x, ((0, rows - x.shape[0]), (0, cols - x.shape[1])))


def _physical_vmem_bytes():
    """Physical VMEM per TensorCore; conservative 64 MiB (v7x) if the query fails."""
    try:
        info = pltpu.get_tpu_info()
        for attr in ("vmem_capacity_bytes", "vmem_bytes", "vmem_size_bytes"):
            cap = getattr(info, attr, None)
            if cap:
                return int(cap)
    except Exception:
        pass
    return 64 << 20


def _vmem_bytes(tb, sp, hp, cbytes):
    """Honest (conservative) VMEM footprint estimate for one grid step."""
    blk = tb * sp * hp
    hid = 2 * blk * cbytes                    # double-buffered hidden block
    out = 2 * tb * hp * 4                     # double-buffered f32 output block
    lens = 2 * tb * 128 * 4                   # lens block (lane-padded)
    weights = 2 * (4 * hp * hp * cbytes       # W1, W2, Wt_a, Wt_h (double-buffer worst case)
                   + hp * 128 * cbytes        # w3 (lane-padded)
                   + 2 * 8 * hp * 4)          # b1+b2, bt (sublane-padded)
    scratch = tb * hp * cbytes                # ht scratch
    # live intermediates: q2 (f32), sig (f32), weighted (cdt) + f32 upcast slack, small vecs
    interm = blk * (4 + 4 + 2 * cbytes) + 4 * tb * sp * 4
    return hid + out + lens + weights + scratch + interm


def _auto_tb(B, Sp, Hp, cbytes, budget, target_block_bytes):
    """Grow the batch tile until the hidden block is ~MiB scale, keep >=2 grid steps,
    then shrink against the VMEM budget."""
    per_ex = max(1, Sp * Hp * cbytes)
    tb = (target_block_bytes // per_ex) // 8 * 8
    tb = max(8, min(tb, _round_up(B, 8)))
    if B > 8:  # keep >= 2 grid steps so "parallel" can shard across v7x's two TCs
        tb = max(8, min(tb, _round_up(-(-B // 2), 8)))
    while tb > 8 and _vmem_bytes(tb, Sp, Hp, cbytes) > budget:
        tb -= 8
    return tb


def _attention_kernel(TB, Sp,
                      gidx_ref,                 # SMEM scalar prefetch (Bp,) int32
                      lens_ref,                 # VMEM (TB, 1) int32  prefix lengths
                      hid_ref,                  # VMEM (TB*Sp, Hp) compute dtype
                      w1_ref, b12_ref,          # (Hp,Hp) cdt, (1,Hp) f32  (bias = b1+b2)
                      w2_ref,                   # (Hp,Hp) cdt
                      w3_ref,                   # (Hp,1)  cdt
                      wta_ref, wth_ref, bt_ref, # (Hp,Hp) cdt x2, (1,Hp) f32
                      out_ref,                  # VMEM (TB, Hp) f32
                      ht_ref):                  # VMEM scratch (TB, Hp) cdt
    f32 = jnp.float32
    cdt = hid_ref.dtype
    base = pl.program_id(0) * TB

    hid2 = hid_ref[...]                                   # (TB*Sp, Hp) cdt
    Hp = hid2.shape[1]
    hid3 = hid2.reshape(TB, Sp, Hp)                       # free view (Sp % 8 == 0)

    # --- gather ht (last valid row per example) into scratch; scales with TB ----
    def gather(i, carry):
        g = gidx_ref[base + i]                            # SMEM scalar
        ht_ref[pl.ds(i, 1), :] = hid_ref[pl.ds(i * Sp + g, 1), :]
        return carry
    jax.lax.fori_loop(0, TB, gather, 0, unroll=False)
    ht = ht_ref[...]                                      # (TB, Hp) cdt

    # --- q1 = ht@W1 + (b1+b2);  q2 = hidden@W2  (b2 folded into the q1 bias) ----
    q1 = jnp.dot(ht, w1_ref[...], preferred_element_type=f32) + b12_ref[...]   # (TB, Hp)
    q2 = jnp.dot(hid2, w2_ref[...], preferred_element_type=f32)                # (TB*Sp, Hp)

    # --- alpha = sigmoid(q1 + q2) @ w3 : q1 broadcast over Sp via free 3-D view -
    sig3 = jax.nn.sigmoid(q1[:, None, :] + q2.reshape(TB, Sp, Hp))             # (TB,Sp,Hp) f32
    alpha = jnp.dot(sig3.reshape(TB * Sp, Hp).astype(cdt), w3_ref[...],
                    preferred_element_type=f32)                                # (TB*Sp, 1)

    # --- a[b] = sum_s mask * alpha * hidden : masked segment-sum on the MXU -----
    weighted3 = alpha.reshape(TB, Sp, 1).astype(cdt) * hid3                    # (TB,Sp,Hp) cdt
    lens = lens_ref[...]                                                       # (TB, 1) int32
    pos = jax.lax.broadcasted_iota(jnp.int32, (TB, 1, Sp), 2)
    mask_t = (pos < lens[:, :, None]).astype(cdt)                              # (TB, 1, Sp)
    a3 = jnp.einsum('bqs,bsh->bqh', mask_t, weighted3,
                    preferred_element_type=f32)                                # (TB, 1, Hp)
    a = a3.reshape(TB, Hp)                                                     # (TB, Hp) f32

    # --- res = a@Wt_a + ht@Wt_h + bt : split weights, no lane-axis concat -------
    res = (jnp.dot(a.astype(cdt), wta_ref[...], preferred_element_type=f32)
           + jnp.dot(ht, wth_ref[...], preferred_element_type=f32)
           + bt_ref[...])
    out_ref[...] = res.astype(out_ref.dtype)


def _build_call(Bp, Sp, Hp, TB, compute_dtype, single_buffer_weights, vmem_limit, cost):
    def wspec(shape):
        if single_buffer_weights and hasattr(pl, "Buffered"):
            # grid-invariant operands: no need for double buffering
            return pl.BlockSpec(shape, lambda g, gi: (0,) * len(shape),
                                pipeline_mode=pl.Buffered(1))
        return pl.BlockSpec(shape, lambda g, gi: (0,) * len(shape))

    grid_spec = pltpu.PrefetchScalarGridSpec(
        num_scalar_prefetch=1,
        grid=(Bp // TB,),
        in_specs=[
            pl.BlockSpec((TB, 1), lambda g, gi: (g, 0)),          # prefix lengths
            pl.BlockSpec((TB * Sp, Hp), lambda g, gi: (g, 0)),    # hidden (flattened)
            wspec((Hp, Hp)), wspec((1, Hp)),                      # W1, b1+b2
            wspec((Hp, Hp)),                                      # W2
            wspec((Hp, 1)),                                       # w3
            wspec((Hp, Hp)), wspec((Hp, Hp)), wspec((1, Hp)),     # Wt_a, Wt_h, bt
        ],
        out_specs=pl.BlockSpec((TB, Hp), lambda g, gi: (g, 0)),
        scratch_shapes=[pltpu.VMEM((TB, Hp), compute_dtype)],
    )
    return pl.pallas_call(
        functools.partial(_attention_kernel, TB, Sp),
        out_shape=jax.ShapeDtypeStruct((Bp, Hp), jnp.float32),
        grid_spec=grid_spec,
        cost_estimate=cost,
        compiler_params=pltpu.CompilerParams(
            dimension_semantics=("parallel",),        # batch tiles are independent
            vmem_limit_bytes=vmem_limit),
    )


def attention_forward(hidden, mask, params, *, block_b=None,
                      compute_dtype=jnp.bfloat16,
                      single_buffer_weights=True,
                      vmem_budget_bytes=None,
                      target_block_bytes=2 << 20):
    """hidden: (B, S, H) f32, mask: (B, S) 0/1 prefix mask, params: dict (see init_params)."""
    B, S, H = hidden.shape
    Hp = _round_up(H, 128)            # lane-dense last dim
    Sp = _round_up(S, 8)              # sublane-aligned sequence
    cbytes = jnp.dtype(compute_dtype).itemsize

    phys = _physical_vmem_bytes()
    if vmem_budget_bytes is None:     # generation-aware budget (64 MiB v7x, 128 MiB v5e/v6e)
        vmem_budget_bytes = max(32 << 20, min(int(phys * 0.7), phys - (20 << 20)))
    vmem_budget_bytes = min(vmem_budget_bytes, phys - (8 << 20))

    if block_b is None:
        TB = _auto_tb(B, Sp, Hp, cbytes, vmem_budget_bytes, target_block_bytes)
    else:
        TB = max(8, _round_up(block_b, 8))
        while TB > 8 and _vmem_bytes(TB, Sp, Hp, cbytes) > vmem_budget_bytes:
            TB -= 8
    Bp = _round_up(max(B, TB), TB)

    est = _vmem_bytes(TB, Sp, Hp, cbytes)
    vmem_limit = int(max(32 << 20, min(est + (8 << 20), phys - (8 << 20))))

    f32 = jnp.float32
    lengths = jnp.sum(mask.astype(jnp.int32), axis=1)
    # torch semantics: length 0 -> index -1 -> last row; clamp to a valid VMEM index.
    gidx = jnp.where(lengths > 0, lengths - 1, S - 1).astype(jnp.int32)
    gidx = jnp.pad(gidx, (0, Bp - B))
    lens_col = jnp.pad(lengths, (0, Bp - B)).astype(jnp.int32).reshape(Bp, 1)

    hid = jnp.pad(hidden, ((0, Bp - B), (0, Sp - S), (0, Hp - H)))
    hid = hid.astype(compute_dtype).reshape(Bp * Sp, Hp)

    w1 = _pad2(params["w1"], Hp, Hp).astype(compute_dtype)
    w2 = _pad2(params["w2"], Hp, Hp).astype(compute_dtype)
    b12 = jnp.pad(params["b1"] + params["b2"], (0, Hp - H)).reshape(1, Hp).astype(f32)
    w3 = _pad2(params["w3"], Hp, 1).astype(compute_dtype)
    wt = params["wt"]
    wt_a = _pad2(wt[:H], Hp, Hp).astype(compute_dtype)     # rows multiplying a
    wt_h = _pad2(wt[H:], Hp, Hp).astype(compute_dtype)     # rows multiplying ht
    bt = jnp.pad(params["bt"], (0, Hp - H)).reshape(1, Hp).astype(f32)

    # advisory cost model for the XLA scheduler around the custom call
    flops = (2 * Bp * Sp * Hp * Hp          # q2 matmul (dominant)
             + 6 * Bp * Hp * Hp             # q1, a@Wt_a, ht@Wt_h
             + 4 * Bp * Sp * Hp)            # alpha dot + masked segment-sum
    bytes_acc = (Bp * Sp * Hp * cbytes + Bp * Hp * 4 + Bp * 8
                 + (4 * Hp * Hp + Hp) * cbytes + 2 * Hp * 4)
    cost = pl.CostEstimate(flops=int(flops), transcendentals=int(Bp * Sp * Hp),
                           bytes_accessed=int(bytes_acc))

    args = (gidx, lens_col, hid, w1, b12, w2, w3, wt_a, wt_h, bt)

    def run(sbw):
        out = _build_call(Bp, Sp, Hp, TB, compute_dtype, sbw, vmem_limit, cost)(*args)
        return jax.block_until_ready(out)

    if single_buffer_weights:
        try:
            out = run(True)
        except Exception:
            # pipeline_mode=pl.Buffered(1) not supported by this jax/libtpu build;
            # fall back to default double-buffered weights (correctness unaffected).
            out = run(False)
    else:
        out = run(False)

    return out[:B, :H]


def init_params(key, H):
    """nn.Linear-like init; weights stored pre-transposed as (in_features, out_features)."""
    ks = jax.random.split(key, 7)
    bnd = 1.0 / (H ** 0.5)
    bnd2 = 1.0 / ((2 * H) ** 0.5)
    u = lambda k, shape, b: jax.random.uniform(k, shape, jnp.float32, -b, b)
    return {
        "w1": u(ks[0], (H, H), bnd), "b1": u(ks[1], (H,), bnd),       # linear_one
        "w2": u(ks[2], (H, H), bnd), "b2": u(ks[3], (H,), bnd),       # linear_two
        "w3": u(ks[4], (H, 1), bnd),                                  # linear_three (no bias)
        "wt": u(ks[5], (2 * H, H), bnd2), "bt": u(ks[6], (H,), bnd2), # linear_transform
    }
    # TODO(synk): is_comp=True branch (linear_compress: 2H -> 1) not exposed; same kernel
    # structure with (Hp, 1) split weights would cover it.


def reference_forward(hidden, mask, params):
    """Pure-JAX f32 reference mirroring the PyTorch forward (HIGHEST-precision dots)."""
    B, S, H = hidden.shape
    prec = jax.lax.Precision.HIGHEST
    lengths = jnp.sum(mask.astype(jnp.int32), axis=1)
    ht = hidden[jnp.arange(B), lengths - 1]                               # (B, H)
    q1 = jnp.dot(ht, params["w1"], precision=prec) + params["b1"]         # (B, H)
    q2 = jnp.dot(hidden, params["w2"], precision=prec) + params["b2"]     # (B, S, H)
    alpha = jnp.dot(jax.nn.sigmoid(q1[:, None, :] + q2), params["w3"],
                    precision=prec)                                       # (B, S, 1)
    a = jnp.sum(alpha * hidden * mask[:, :, None].astype(jnp.float32), axis=1)  # (B, H)
    cat = jnp.concatenate([a, ht], axis=1)                                # (B, 2H)
    return jnp.dot(cat, params["wt"], precision=prec) + params["bt"]      # (B, H)


if __name__ == "__main__":
    key = jax.random.PRNGKey(0)
    k_h, k_p, k_h2, k_l2, k_h3, k_l3 = jax.random.split(key, 6)

    # ---- primary check: small shapes consistent with the module (f32 path) ----
    B, S, H = 2, 8, 32
    hidden = jax.random.normal(k_h, (B, S, H), jnp.float32)
    lengths = jnp.array([5, 8], dtype=jnp.int32)                  # prefix valid lengths
    mask = (jnp.arange(S)[None, :] < lengths[:, None]).astype(jnp.int32)
    params = init_params(k_p, H)

    ref = reference_forward(hidden, mask, params)
    out = attention_forward(hidden, mask, params, compute_dtype=jnp.float32)
    assert out.shape == (B, H)
    assert jnp.allclose(out, ref, atol=3e-2, rtol=3e-2), "f32 kernel mismatch vs reference"

    # ---- unaligned B/S: padding + multi-step grid (f32 path) ------------------
    B2, S2 = 9, 12
    hidden2 = jax.random.normal(k_h2, (B2, S2, H), jnp.float32)
    lengths2 = jax.random.randint(k_l2, (B2,), 1, S2 + 1)
    mask2 = (jnp.arange(S2)[None, :] < lengths2[:, None]).astype(jnp.int32)
    ref2 = reference_forward(hidden2, mask2, params)
    out2 = attention_forward(hidden2, mask2, params, compute_dtype=jnp.float32)
    assert out2.shape == (B2, H)
    assert jnp.allclose(out2, ref2, atol=3e-2, rtol=3e-2), "padded/multi-step mismatch"

    # ---- default path (bfloat16 compute) on the small shape -------------------
    out_bf16 = attention_forward(hidden, mask, params)
    assert jnp.allclose(out_bf16, ref, atol=1e-1, rtol=1e-1), "bf16 kernel drifted too far"

    # ---- default path on a larger shape: exercises auto-TB + >=2 grid steps ---
    B3, S3, H3 = 96, 20, 100
    hidden3 = jax.random.normal(k_h3, (B3, S3, H3), jnp.float32)
    lengths3 = jax.random.randint(k_l3, (B3,), 1, S3 + 1)
    mask3 = (jnp.arange(S3)[None, :] < lengths3[:, None]).astype(jnp.int32)
    params3 = init_params(k_p, H3)
    ref3 = reference_forward(hidden3, mask3, params3)
    out3 = attention_forward(hidden3, mask3, params3)
    assert out3.shape == (B3, H3)
    assert jnp.allclose(out3, ref3, atol=1.5e-1, rtol=1.5e-1), "large bf16 mismatch"

    print("KERNEL_OK")
</pallas_src>

<mosaic_0001>
module attributes {stable_mosaic.version = 11 : i64} {
  func.func @_attention_kernel(%arg0: i32, %arg1: memref<8xi32, #tpu.memory_space<smem>>, %arg2: memref<8x1xi32, #tpu.memory_space<vmem>>, %arg3: memref<64x128xf32, #tpu.memory_space<vmem>>, %arg4: memref<128x128xf32, #tpu.memory_space<vmem>>, %arg5: memref<1x128xf32, #tpu.memory_space<vmem>>, %arg6: memref<128x128xf32, #tpu.memory_space<vmem>>, %arg7: memref<128x1xf32, #tpu.memory_space<vmem>>, %arg8: memref<128x128xf32, #tpu.memory_space<vmem>>, %arg9: memref<128x128xf32, #tpu.memory_space<vmem>>, %arg10: memref<1x128xf32, #tpu.memory_space<vmem>>, %arg11: memref<8x128xf32, #tpu.memory_space<vmem>>, %arg12: memref<8x128xf32, #tpu.memory_space<vmem>>) attributes {dimension_semantics = [#tpu.dimension_semantics<parallel>], iteration_bounds = array<i64: 1>, scalar_prefetch = 1 : i64, scratch_operands = 1 : i64, tpu.core_type = #tpu.core_type<tc>, window_params = [{transform_indices = @transform_0, window_bounds = array<i64: 8, 1>}, {transform_indices = @transform_1, window_bounds = array<i64: 64, 128>}, {pipeline_mode = #tpu.pipeline_mode<synchronous>, transform_indices = @transform_2, window_bounds = array<i64: 128, 128>}, {pipeline_mode = #tpu.pipeline_mode<synchronous>, transform_indices = @transform_3, window_bounds = array<i64: 1, 128>}, {pipeline_mode = #tpu.pipeline_mode<synchronous>, transform_indices = @transform_4, window_bounds = array<i64: 128, 128>}, {pipeline_mode = #tpu.pipeline_mode<synchronous>, transform_indices = @transform_5, window_bounds = array<i64: 128, 1>}, {pipeline_mode = #tpu.pipeline_mode<synchronous>, transform_indices = @transform_6, window_bounds = array<i64: 128, 128>}, {pipeline_mode = #tpu.pipeline_mode<synchronous>, transform_indices = @transform_7, window_bounds = array<i64: 128, 128>}, {pipeline_mode = #tpu.pipeline_mode<synchronous>, transform_indices = @transform_8, window_bounds = array<i64: 1, 128>}, {transform_indices = @transform_9, window_bounds = array<i64: 8, 128>}]} {
    %c8_i32 = arith.constant 8 : i32
    %0 = arith.muli %arg0, %c8_i32 : i32
    %c0 = arith.constant 0 : index
    %c0_0 = arith.constant 0 : index
    %1 = vector.load %arg3[%c0, %c0_0] : memref<64x128xf32, #tpu.memory_space<vmem>>, vector<64x128xf32>
    %2 = vector.shape_cast %1 : vector<64x128xf32> to vector<8x8x128xf32>
    %c0_i32 = arith.constant 0 : i32
    %c8_i32_1 = arith.constant 8 : i32
    %3 = arith.addi %c0_i32, %c8_i32_1 : i32
    %c1_i32 = arith.constant 1 : i32
    scf.for %arg13 = %c0_i32 to %3 step %c1_i32  : i32 {
      %45 = arith.addi %0, %arg13 : i32
      %46 = arith.index_cast %45 : i32 to index
      %47 = memref.load %arg1[%46] : memref<8xi32, #tpu.memory_space<smem>>
      %c8_i32_29 = arith.constant 8 : i32
      %48 = arith.muli %arg13, %c8_i32_29 : i32
      %49 = arith.addi %48, %47 : i32
      %50 = arith.index_cast %49 : i32 to index
      %c0_30 = arith.constant 0 : index
      %51 = vector.load %arg3[%50, %c0_30] : memref<64x128xf32, #tpu.memory_space<vmem>>, vector<1x128xf32>
      %52 = arith.index_cast %arg13 : i32 to index
      %c0_31 = arith.constant 0 : index
      %53 = vector.load %arg12[%52, %c0_31] : memref<8x128xf32, #tpu.memory_space<vmem>>, vector<1x128xf32>
      tpu.vector_store %arg12[%52, %c0_31], %51 {strides = array<i32>} : memref<8x128xf32, #tpu.memory_space<vmem>>, vector<1x128xf32>,
    }
    %c8_i32_2 = arith.constant 8 : i32
    %c0_3 = arith.constant 0 : index
    %c0_4 = arith.constant 0 : index
    %4 = vector.load %arg12[%c0_3, %c0_4] : memref<8x128xf32, #tpu.memory_space<vmem>>, vector<8x128xf32>
    %c0_5 = arith.constant 0 : index
    %c0_6 = arith.constant 0 : index
    %5 = vector.load %arg4[%c0_5, %c0_6] : memref<128x128xf32, #tpu.memory_space<vmem>>, vector<128x128xf32>
    %cst = arith.constant dense<0.000000e+00> : vector<8x128xf32>
    %6 = tpu.matmul %4, %5, %cst {dimension_numbers = #tpu.dot_dimension_numbers<[1], [0], [0], [1], [0, 0, 1, 1], [], []>} : vector<8x128xf32>, vector<128x128xf32>, vector<8x128xf32> -> vector<8x128xf32>
    %c0_7 = arith.constant 0 : index
    %c0_8 = arith.constant 0 : index
    %7 = vector.load %arg5[%c0_7, %c0_8] : memref<1x128xf32, #tpu.memory_space<vmem>>, vector<1x128xf32>
    %8 = vector.broadcast %7 : vector<1x128xf32> to vector<8x128xf32>
    %9 = arith.addf %6, %8 : vector<8x128xf32>
    %c0_9 = arith.constant 0 : index
    %c0_10 = arith.constant 0 : index
    %10 = vector.load %arg6[%c0_9, %c0_10] : memref<128x128xf32, #tpu.memory_space<vmem>>, vector<128x128xf32>
    %cst_11 = arith.constant dense<0.000000e+00> : vector<64x128xf32>
    %11 = tpu.matmul %1, %10, %cst_11 {dimension_numbers = #tpu.dot_dimension_numbers<[1], [0], [0], [1], [0, 0, 1, 1], [], []>} : vector<64x128xf32>, vector<128x128xf32>, vector<64x128xf32> -> vector<64x128xf32>
    %12 = vector.shape_cast %9 : vector<8x128xf32> to vector<8x1x128xf32>
    %13 = vector.shape_cast %11 : vector<64x128xf32> to vector<8x8x128xf32>
    %14 = vector.broadcast %12 : vector<8x1x128xf32> to vector<8x8x128xf32>
    %15 = arith.addf %14, %13 : vector<8x8x128xf32>
    %16 = arith.negf %15 : vector<8x8x128xf32>
    %17 = math.exp %16 : vector<8x8x128xf32>
    %cst_12 = arith.constant 1.000000e+00 : f32
    %18 = vector.broadcast %cst_12 : f32 to vector<8x8x128xf32>
    %19 = arith.addf %18, %17 : vector<8x8x128xf32>
    %20 = arith.divf %18, %19 : vector<8x8x128xf32>
    %21 = vector.shape_cast %20 : vector<8x8x128xf32> to vector<64x128xf32>
    %c0_13 = arith.constant 0 : index
    %c0_14 = arith.constant 0 : index
    %22 = vector.load %arg7[%c0_13, %c0_14] : memref<128x1xf32, #tpu.memory_space<vmem>>, vector<128x1xf32>
    %cst_15 = arith.constant dense<0.000000e+00> : vector<64x1xf32>
    %23 = tpu.matmul %21, %22, %cst_15 {dimension_numbers = #tpu.dot_dimension_numbers<[1], [0], [0], [1], [0, 0, 1, 1], [], []>} : vector<64x128xf32>, vector<128x1xf32>, vector<64x1xf32> -> vector<64x1xf32>
    %24 = vector.shape_cast %23 : vector<64x1xf32> to vector<8x8x1xf32>
    %25 = vector.broadcast %24 : vector<8x8x1xf32> to vector<8x8x128xf32>
    %26 = arith.mulf %25, %2 : vector<8x8x128xf32>
    %c0_16 = arith.constant 0 : index
    %c0_17 = arith.constant 0 : index
    %27 = vector.load %arg2[%c0_16, %c0_17] : memref<8x1xi32, #tpu.memory_space<vmem>>, vector<8x1xi32>
    %28 = tpu.iota {dimensions = array<i32: 2>} : vector<8x1x8xi32>
    %29 = vector.shape_cast %27 : vector<8x1xi32> to vector<8x1x1xi32>
    %30 = vector.broadcast %29 : vector<8x1x1xi32> to vector<8x1x8xi32>
    %31 = arith.cmpi slt, %28, %30 : vector<8x1x8xi32>
    %32 = arith.extui %31 : vector<8x1x8xi1> to vector<8x1x8xi32>
    %33 = arith.sitofp %32 : vector<8x1x8xi32> to vector<8x1x8xf32>
    "tpu.trace_start"() <{level = 10 : i32, message = "bqs,bsh->bqh"}> : () -> ()
    %cst_18 = arith.constant dense<0.000000e+00> : vector<8x1x128xf32>
    %34 = tpu.matmul %33, %26, %cst_18 {dimension_numbers = #tpu.dot_dimension_numbers<[2], [1], [1], [2], [0, 0, 0, 1, 1, 2], [0], [0]>} : vector<8x1x8xf32>, vector<8x8x128xf32>, vector<8x1x128xf32> -> vector<8x1x128xf32>
    "tpu.trace_stop"() : () -> ()
    %35 = vector.shape_cast %34 : vector<8x1x128xf32> to vector<8x128xf32>
    %c0_19 = arith.constant 0 : index
    %c0_20 = arith.constant 0 : index
    %36 = vector.load %arg8[%c0_19, %c0_20] : memref<128x128xf32, #tpu.memory_space<vmem>>, vector<128x128xf32>
    %cst_21 = arith.constant dense<0.000000e+00> : vector<8x128xf32>
    %37 = tpu.matmul %35, %36, %cst_21 {dimension_numbers = #tpu.dot_dimension_numbers<[1], [0], [0], [1], [0, 0, 1, 1], [], []>} : vector<8x128xf32>, vector<128x128xf32>, vector<8x128xf32> -> vector<8x128xf32>
    %c0_22 = arith.constant 0 : index
    %c0_23 = arith.constant 0 : index
    %38 = vector.load %arg9[%c0_22, %c0_23] : memref<128x128xf32, #tpu.memory_space<vmem>>, vector<128x128xf32>
    %cst_24 = arith.constant dense<0.000000e+00> : vector<8x128xf32>
    %39 = tpu.matmul %4, %38, %cst_24 {dimension_numbers = #tpu.dot_dimension_numbers<[1], [0], [0], [1], [0, 0, 1, 1], [], []>} : vector<8x128xf32>, vector<128x128xf32>, vector<8x128xf32> -> vector<8x128xf32>
    %40 = arith.addf %37, %39 : vector<8x128xf32>
    %c0_25 = arith.constant 0 : index
    %c0_26 = arith.constant 0 : index
    %41 = vector.load %arg10[%c0_25, %c0_26] : memref<1x128xf32, #tpu.memory_space<vmem>>, vector<1x128xf32>
    %42 = vector.broadcast %41 : vector<1x128xf32> to vector<8x128xf32>
    %43 = arith.addf %40, %42 : vector<8x128xf32>
    %c0_27 = arith.constant 0 : index
    %c0_28 = arith.constant 0 : index
    %44 = vector.load %arg11[%c0_27, %c0_28] : memref<8x128xf32, #tpu.memory_space<vmem>>, vector<8x128xf32>
    tpu.vector_store %arg11[%c0_27, %c0_28], %43 {strides = array<i32>} : memref<8x128xf32, #tpu.memory_space<vmem>>, vector<8x128xf32>,
    return
  }
  func.func @transform_0(%arg0: i32, %arg1: memref<8xi32, #tpu.memory_space<smem>>) -> (i32, i32) {
    %c0_i32 = arith.constant 0 : i32
    %c0_i32_0 = arith.constant 0 : i32
    return %arg0, %c0_i32 : i32, i32
  }
  func.func @transform_1(%arg0: i32, %arg1: memref<8xi32, #tpu.memory_space<smem>>) -> (i32, i32) {
    %c0_i32 = arith.constant 0 : i32
    %c0_i32_0 = arith.constant 0 : i32
    return %arg0, %c0_i32 : i32, i32
  }
  func.func @transform_2(%arg0: i32, %arg1: memref<8xi32, #tpu.memory_space<smem>>) -> (i32, i32) {
    %c0_i32 = arith.constant 0 : i32
    %c0_i32_0 = arith.constant 0 : i32
    %c0_i32_1 = arith.constant 0 : i32
    return %c0_i32, %c0_i32_0 : i32, i32
  }
  func.func @transform_3(%arg0: i32, %arg1: memref<8xi32, #tpu.memory_space<smem>>) -> (i32, i32) {
    %c0_i32 = arith.constant 0 : i32
    %c0_i32_0 = arith.constant 0 : i32
    %c0_i32_1 = arith.constant 0 : i32
    return %c0_i32, %c0_i32_0 : i32, i32
  }
  func.func @transform_4(%arg0: i32, %arg1: memref<8xi32, #tpu.memory_space<smem>>) -> (i32, i32) {
    %c0_i32 = arith.constant 0 : i32
    %c0_i32_0 = arith.constant 0 : i32
    %c0_i32_1 = arith.constant 0 : i32
    return %c0_i32, %c0_i32_0 : i32, i32
  }
  func.func @transform_5(%arg0: i32, %arg1: memref<8xi32, #tpu.memory_space<smem>>) -> (i32, i32) {
    %c0_i32 = arith.constant 0 : i32
    %c0_i32_0 = arith.constant 0 : i32
    %c0_i32_1 = arith.constant 0 : i32
    return %c0_i32, %c0_i32_0 : i32, i32
  }
  func.func @transform_6(%arg0: i32, %arg1: memref<8xi32, #tpu.memory_space<smem>>) -> (i32, i32) {
    %c0_i32 = arith.constant 0 : i32
    %c0_i32_0 = arith.constant 0 : i32
    %c0_i32_1 = arith.constant 0 : i32
    return %c0_i32, %c0_i32_0 : i32, i32
  }
  func.func @transform_7(%arg0: i32, %arg1: memref<8xi32, #tpu.memory_space<smem>>) -> (i32, i32) {
    %c0_i32 = arith.constant 0 : i32
    %c0_i32_0 = arith.constant 0 : i32
    %c0_i32_1 = arith.constant 0 : i32
    return %c0_i32, %c0_i32_0 : i32, i32
  }
  func.func @transform_8(%arg0: i32, %arg1: memref<8xi32, #tpu.memory_space<smem>>) -> (i32, i32) {
    %c0_i32 = arith.constant 0 : i32
    %c0_i32_0 = arith.constant 0 : i32
    %c0_i32_1 = arith.constant 0 : i32
    return %c0_i32, %c0_i32_0 : i32, i32
  }
  func.func @transform_9(%arg0: i32, %arg1: memref<8xi32, #tpu.memory_space<smem>>) -> (i32, i32) {
    %c0_i32 = arith.constant 0 : i32
    %c0_i32_0 = arith.constant 0 : i32
    return %arg0, %c0_i32 : i32, i32
  }
}

module attributes {stable_mosaic.version = 11 : i64} {
  func.func @_attention_kernel(%arg0: i32, %arg1: memref<8xi32, #tpu.memory_space<smem>>, %arg2: memref<8x1xi32, #tpu.memory_space<vmem>>, %arg3: memref<64x128xf32, #tpu.memory_space<vmem>>, %arg4: memref<128x128xf32, #tpu.memory_space<vmem>>, %arg5: memref<1x128xf32, #tpu.memory_space<vmem>>, %arg6: memref<128x128xf32, #tpu.memory_space<vmem>>, %arg7: memref<128x1xf32, #tpu.memory_space<vmem>>, %arg8: memref<128x128xf32, #tpu.memory_space<vmem>>, %arg9: memref<128x128xf32, #tpu.memory_space<vmem>>, %arg10: memref<1x128xf32, #tpu.memory_space<vmem>>, %arg11: memref<8x128xf32, #tpu.memory_space<vmem>>, %arg12: memref<8x128xf32, #tpu.memory_space<vmem>>) attributes {dimension_semantics = [#tpu.dimension_semantics<parallel>], iteration_bounds = array<i64: 1>, scalar_prefetch = 1 : i64, scratch_operands = 1 : i64, tpu.core_type = #tpu.core_type<tc>, window_params = [{transform_indices = @transform_0, window_bounds = array<i64: 8, 1>}, {transform_indices = @transform_1, window_bounds = array<i64: 64, 128>}, {pipeline_mode = #tpu.pipeline_mode<synchronous>, transform_indices = @transform_2, window_bounds = array<i64: 128, 128>}, {pipeline_mode = #tpu.pipeline_mode<synchronous>, transform_indices = @transform_3, window_bounds = array<i64: 1, 128>}, {pipeline_mode = #tpu.pipeline_mode<synchronous>, transform_indices = @transform_4, window_bounds = array<i64: 128, 128>}, {pipeline_mode = #tpu.pipeline_mode<synchronous>, transform_indices = @transform_5, window_bounds = array<i64: 128, 1>}, {pipeline_mode = #tpu.pipeline_mode<synchronous>, transform_indices = @transform_6, window_bounds = array<i64: 128, 128>}, {pipeline_mode = #tpu.pipeline_mode<synchronous>, transform_indices = @transform_7, window_bounds = array<i64: 128, 128>}, {pipeline_mode = #tpu.pipeline_mode<synchronous>, transform_indices = @transform_8, window_bounds = array<i64: 1, 128>}, {transform_indices = @transform_9, window_bounds = array<i64: 8, 128>}]} {
    %c8_i32 = arith.constant 8 : i32
    %0 = arith.muli %arg0, %c8_i32 : i32
    %c0 = arith.constant 0 : index
    %c0_0 = arith.constant 0 : index
    %1 = vector.load %arg3[%c0, %c0_0] : memref<64x128xf32, #tpu.memory_space<vmem>>, vector<64x128xf32>
    %2 = vector.shape_cast %1 : vector<64x128xf32> to vector<8x8x128xf32>
    %c0_i32 = arith.constant 0 : i32
    %c8_i32_1 = arith.constant 8 : i32
    %3 = arith.addi %c0_i32, %c8_i32_1 : i32
    %c1_i32 = arith.constant 1 : i32
    scf.for %arg13 = %c0_i32 to %3 step %c1_i32  : i32 {
      %45 = arith.addi %0, %arg13 : i32
      %46 = arith.index_cast %45 : i32 to index
      %47 = memref.load %arg1[%46] : memref<8xi32, #tpu.memory_space<smem>>
      %c8_i32_29 = arith.constant 8 : i32
      %48 = arith.muli %arg13, %c8_i32_29 : i32
      %49 = arith.addi %48, %47 : i32
      %50 = arith.index_cast %49 : i32 to index
      %c0_30 = arith.constant 0 : index
      %51 = vector.load %arg3[%50, %c0_30] : memref<64x128xf32, #tpu.memory_space<vmem>>, vector<1x128xf32>
      %52 = arith.index_cast %arg13 : i32 to index
      %c0_31 = arith.constant 0 : index
      %53 = vector.load %arg12[%52, %c0_31] : memref<8x128xf32, #tpu.memory_space<vmem>>, vector<1x128xf32>
      tpu.vector_store %arg12[%52, %c0_31], %51 {strides = array<i32>} : memref<8x128xf32, #tpu.memory_space<vmem>>, vector<1x128xf32>,
    }
    %c8_i32_2 = arith.constant 8 : i32
    %c0_3 = arith.constant 0 : index
    %c0_4 = arith.constant 0 : index
    %4 = vector.load %arg12[%c0_3, %c0_4] : memref<8x128xf32, #tpu.memory_space<vmem>>, vector<8x128xf32>
    %c0_5 = arith.constant 0 : index
    %c0_6 = arith.constant 0 : index
    %5 = vector.load %arg4[%c0_5, %c0_6] : memref<128x128xf32, #tpu.memory_space<vmem>>, vector<128x128xf32>
    %cst = arith.constant dense<0.000000e+00> : vector<8x128xf32>
    %6 = tpu.matmul %4, %5, %cst {dimension_numbers = #tpu.dot_dimension_numbers<[1], [0], [0], [1], [0, 0, 1, 1], [], []>} : vector<8x128xf32>, vector<128x128xf32>, vector<8x128xf32> -> vector<8x128xf32>
    %c0_7 = arith.constant 0 : index
    %c0_8 = arith.constant 0 : index
    %7 = vector.load %arg5[%c0_7, %c0_8] : memref<1x128xf32, #tpu.memory_space<vmem>>, vector<1x128xf32>
    %8 = vector.broadcast %7 : vector<1x128xf32> to vector<8x128xf32>
    %9 = arith.addf %6, %8 : vector<8x128xf32>
    %c0_9 = arith.constant 0 : index
    %c0_10 = arith.constant 0 : index
    %10 = vector.load %arg6[%c0_9, %c0_10] : memref<128x128xf32, #tpu.memory_space<vmem>>, vector<128x128xf32>
    %cst_11 = arith.constant dense<0.000000e+00> : vector<64x128xf32>
    %11 = tpu.matmul %1, %10, %cst_11 {dimension_numbers = #tpu.dot_dimension_numbers<[1], [0], [0], [1], [0, 0, 1, 1], [], []>} : vector<64x128xf32>, vector<128x128xf32>, vector<64x128xf32> -> vector<64x128xf32>
    %12 = vector.shape_cast %9 : vector<8x128xf32> to vector<8x1x128xf32>
    %13 = vector.shape_cast %11 : vector<64x128xf32> to vector<8x8x128xf32>
    %14 = vector.broadcast %12 : vector<8x1x128xf32> to vector<8x8x128xf32>
    %15 = arith.addf %14, %13 : vector<8x8x128xf32>
    %16 = arith.negf %15 : vector<8x8x128xf32>
    %17 = math.exp %16 : vector<8x8x128xf32>
    %cst_12 = arith.constant 1.000000e+00 : f32
    %18 = vector.broadcast %cst_12 : f32 to vector<8x8x128xf32>
    %19 = arith.addf %18, %17 : vector<8x8x128xf32>
    %20 = arith.divf %18, %19 : vector<8x8x128xf32>
    %21 = vector.shape_cast %20 : vector<8x8x128xf32> to vector<64x128xf32>
    %c0_13 = arith.constant 0 : index
    %c0_14 = arith.constant 0 : index
    %22 = vector.load %arg7[%c0_13, %c0_14] : memref<128x1xf32, #tpu.memory_space<vmem>>, vector<128x1xf32>
    %cst_15 = arith.constant dense<0.000000e+00> : vector<64x1xf32>
    %23 = tpu.matmul %21, %22, %cst_15 {dimension_numbers = #tpu.dot_dimension_numbers<[1], [0], [0], [1], [0, 0, 1, 1], [], []>} : vector<64x128xf32>, vector<128x1xf32>, vector<64x1xf32> -> vector<64x1xf32>
    %24 = vector.shape_cast %23 : vector<64x1xf32> to vector<8x8x1xf32>
    %25 = vector.broadcast %24 : vector<8x8x1xf32> to vector<8x8x128xf32>
    %26 = arith.mulf %25, %2 : vector<8x8x128xf32>
    %c0_16 = arith.constant 0 : index
    %c0_17 = arith.constant 0 : index
    %27 = vector.load %arg2[%c0_16, %c0_17] : memref<8x1xi32, #tpu.memory_space<vmem>>, vector<8x1xi32>
    %28 = tpu.iota {dimensions = array<i32: 2>} : vector<8x1x8xi32>
    %29 = vector.shape_cast %27 : vector<8x1xi32> to vector<8x1x1xi32>
    %30 = vector.broadcast %29 : vector<8x1x1xi32> to vector<8x1x8xi32>
    %31 = arith.cmpi slt, %28, %30 : vector<8x1x8xi32>
    %32 = arith.extui %31 : vector<8x1x8xi1> to vector<8x1x8xi32>
    %33 = arith.sitofp %32 : vector<8x1x8xi32> to vector<8x1x8xf32>
    "tpu.trace_start"() <{level = 10 : i32, message = "bqs,bsh->bqh"}> : () -> ()
    %cst_18 = arith.constant dense<0.000000e+00> : vector<8x1x128xf32>
    %34 = tpu.matmul %33, %26, %cst_18 {dimension_numbers = #tpu.dot_dimension_numbers<[2], [1], [1], [2], [0, 0, 0, 1, 1, 2], [0], [0]>} : vector<8x1x8xf32>, vector<8x8x128xf32>, vector<8x1x128xf32> -> vector<8x1x128xf32>
    "tpu.trace_stop"() : () -> ()
    %35 = vector.shape_cast %34 : vector<8x1x128xf32> to vector<8x128xf32>
    %c0_19 = arith.constant 0 : index
    %c0_20 = arith.constant 0 : index
    %36 = vector.load %arg8[%c0_19, %c0_20] : memref<128x128xf32, #tpu.memory_space<vmem>>, vector<128x128xf32>
    %cst_21 = arith.constant dense<0.000000e+00> : vector<8x128xf32>
    %37 = tpu.matmul %35, %36, %cst_21 {dimension_numbers = #tpu.dot_dimension_numbers<[1], [0], [0], [1], [0, 0, 1, 1], [], []>} : vector<8x128xf32>, vector<128x128xf32>, vector<8x128xf32> -> vector<8x128xf32>
    %c0_22 = arith.constant 0 : index
    %c0_23 = arith.constant 0 : index
    %38 = vector.load %arg9[%c0_22, %c0_23] : memref<128x128xf32, #tpu.memory_space<vmem>>, vector<128x128xf32>
    %cst_24 = arith.constant dense<0.000000e+00> : vector<8x128xf32>
    %39 = tpu.matmul %4, %38, %cst_24 {dimension_numbers = #tpu.dot_dimension_numbers<[1], [0], [0], [1], [0, 0, 1, 1], [], []>} : vector<8x128xf32>, vector<128x128xf32>, vector<8x128xf32> -> vector<8x128xf32>
    %40 = arith.addf %37, %39 : vector<8x128xf32>
    %c0_25 = arith.constant 0 : index
    %c0_26 = arith.constant 0 : index
    %41 = vector.load %arg10[%c0_25, %c0_26] : memref<1x128xf32, #tpu.memory_space<vmem>>, vector<1x128xf32>
    %42 = vector.broadcast %41 : vector<1x128xf32> to vector<8x128xf32>
    %43 = arith.addf %40, %42 : vector<8x128xf32>
    %c0_27 = arith.constant 0 : index
    %c0_28 = arith.constant 0 : index
    %44 = vector.load %arg11[%c0_27, %c0_28] : memref<8x128xf32, #tpu.memory_space<vmem>>, vector<8x128xf32>
    tpu.vector_store %arg11[%c0_27, %c0_28], %43 {strides = array<i32>} : memref<8x128xf32, #tpu.memory_space<vmem>>, vector<8x128xf32>,
    return
  }
  func.func @transform_0(%arg0: i32, %arg1: memref<8xi32, #tpu.memory_space<smem>>) -> (i32, i32) {
    %c0_i32 = arith.constant 0 : i32
    %c0_i32_0 = arith.constant 0 : i32
    return %arg0, %c0_i32 : i32, i32
  }
  func.func @transform_1(%arg0: i32, %arg1: memref<8xi32, #tpu.memory_space<smem>>) -> (i32, i32) {
    %c0_i32 = arith.constant 0 : i32
    %c0_i32_0 = arith.constant 0 : i32
    return %arg0, %c0_i32 : i32, i32
  }
  func.func @transform_2(%arg0: i32, %arg1: memref<8xi32, #tpu.memory_space<smem>>) -> (i32, i32) {
    %c0_i32 = arith.constant 0 : i32
    %c0_i32_0 = arith.constant 0 : i32
    %c0_i32_1 = arith.constant 0 : i32
    return %c0_i32, %c0_i32_0 : i32, i32
  }
  func.func @transform_3(%arg0: i32, %arg1: memref<8xi32, #tpu.memory_space<smem>>) -> (i32, i32) {
    %c0_i32 = arith.constant 0 : i32
    %c0_i32_0 = arith.constant 0 : i32
    %c0_i32_1 = arith.constant 0 : i32
    return %c0_i32, %c0_i32_0 : i32, i32
  }
  func.func @transform_4(%arg0: i32, %arg1: memref<8xi32, #tpu.memory_space<smem>>) -> (i32, i32) {
    %c0_i32 = arith.constant 0 : i32
    %c0_i32_0 = arith.constant 0 : i32
    %c0_i32_1 = arith.constant 0 : i32
    return %c0_i32, %c0_i32_0 : i32, i32
  }
  func.func @transform_5(%arg0: i32, %arg1: memref<8xi32, #tpu.memory_space<smem>>) -> (i32, i32) {
    %c0_i32 = arith.constant 0 : i32
    %c0_i32_0 = arith.constant 0 : i32
    %c0_i32_1 = arith.constant 0 : i32
    return %c0_i32, %c0_i32_0 : i32, i32
  }
  func.func @transform_6(%arg0: i32, %arg1: memref<8xi32, #tpu.memory_space<smem>>) -> (i32, i32) {
    %c0_i32 = arith.constant 0 : i32
    %c0_i32_0 = arith.constant 0 : i32
    %c0_i32_1 = arith.constant 0 : i32
    return %c0_i32, %c0_i32_0 : i32, i32
  }
  func.func @transform_7(%arg0: i32, %arg1: memref<8xi32, #tpu.memory_space<smem>>) -> (i32, i32) {
    %c0_i32 = arith.constant 0 : i32
    %c0_i32_0 = arith.constant 0 : i32
    %c0_i32_1 = arith.constant 0 : i32
    return %c0_i32, %c0_i32_0 : i32, i32
  }
  func.func @transform_8(%arg0: i32, %arg1: memref<8xi32, #tpu.memory_space<smem>>) -> (i32, i32) {
    %c0_i32 = arith.constant 0 : i32
    %c0_i32_0 = arith.constant 0 : i32
    %c0_i32_1 = arith.constant 0 : i32
    return %c0_i32, %c0_i32_0 : i32, i32
  }
  func.func @transform_9(%arg0: i32, %arg1: memref<8xi32, #tpu.memory_space<smem>>) -> (i32, i32) {
    %c0_i32 = arith.constant 0 : i32
    %c0_i32_0 = arith.constant 0 : i32
    return %arg0, %c0_i32 : i32, i32
  }
}

</mosaic_0001>

<bundles_post_ra>
// kernel: tpu_custom_call.1
= control target key start
LH: loop header
LB: loop body
LE: loop exit
PB: predicated region body
PF: predicated region fallthrough
CT: control target
= control target key end

     0   :  { %s2553_s0 = inlined_call_operand.vmem [shape: s32[8], index: 0, kind: input, shape index: {}]   ;;  %s2554_s1 = inlined_call_operand.vmem [shape: s32[8,1], index: 1, kind: input, shape index: {}]   ;;  %s2555_s2 = inlined_call_operand.hbm [shape: f32[64,128], index: 2, kind: input, shape index: {}]   ;;  %s2556_s3 = inlined_call_operand.vmem [shape: f32[128,128], index: 3, kind: input, shape index: {}]   ;;  %s2557_s4 = inlined_call_operand.vmem [shape: f32[1,128], index: 4, kind: input, shape index: {}]   ;;  %s2558_s5 = inlined_call_operand.hbm [shape: f32[128,128], index: 5, kind: input, shape index: {}]   ;;  %s2559_s6 = inlined_call_operand.vmem [shape: f32[128,1], index: 6, kind: input, shape index: {}]   ;;  %s2560_s7 = inlined_call_operand.hbm [shape: f32[128,128], index: 7, kind: input, shape index: {}]   ;;  %s2561_s8 = inlined_call_operand.hbm [shape: f32[128,128], index: 8, kind: input, shape index: {}]   ;;  %s2562_s9 = inlined_call_operand.vmem [shape: f32[1,128], index: 9, kind: input, shape index: {}]   ;;  %s2563_s10 = inlined_call_operand.hbm [shape: f32[8,128], index: 10, kind: output, shape index: {}]  }
   0x1   :  { %s15_s15 = sshll.u32 %s2553_s0, 4  ;;  %s16_s15 = int_to_ptr.vmem [resolvable:$true] %s15_s15 }
   0x2   :  { %s2032_s16 = scalar_lea.vmem %s16_s15, 16  ;;  %p2037_p1 = scmp.lt.s32.totalorder %s16_s15, %s16_s15 }
   0x3   :  { %p2033_p0 = scmp.ne.s32.totalorder %s16_s15, %s2032_s16  ;;  %p2038_p2 = scmp.lt.s32.totalorder %s2032_s16, %s2032_s16 }
   0x5   :  { %p2039_p3 = por %p2038_p2, %p2037_p1 }
   0x7   :  { %p2040_p4 = pnand %p2039_p3, %p2033_p0 }
   0x9   :  { %2043 = shalt.err (!%p2040_p4)  }
   0xa   :  { %s2162_s17 = smov [#allocation4]  }
   0xb   :  { %18 = dma.vmem_to_smem %s16_s15, 16, %s2162_s17, [#allocation3] }
   0xc   :  { %2148 = dma.done.wait [#allocation3], 16 }
   0xd   :  { %2149 = vsyncadd [#allocation3], 4294967280 }
   0xe   :  { %20 = sfence }
   0xf   :  { %21 = vsyncpa [#allocation6], 0 }
  0x10   :  { %22 = vsyncpa [#allocation9], 0 }
  0x11   :  { %23 = vsyncpa [#allocation12], 0 }
  0x12   :  { %24 = vsyncpa [#allocation7], 0  ;;  %s2163_s18 = smov [#allocation8]   ;;  %s2164_s0 = smov [#allocation5]  }
  0x13   :  { %s48_s19 = sshll.u32 %s2163_s18, 4  ;;  %s32_s20 = sshll.u32 %s2164_s0, 4  ;;  %s49_s19 = int_to_ptr.vmem [resolvable:$true] %s48_s19  ;;  %s33_s20 = int_to_ptr.vmem [resolvable:$true] %s32_s20 }
  0x14   :  { %s2052_s21 = scalar_lea.vmem %s49_s19, 2048  ;;  %p2057_p6 = scmp.lt.s32.totalorder %s49_s19, %s49_s19 }
  0x15   :  { %p2053_p5 = scmp.ne.s32.totalorder %s49_s19, %s2052_s21  ;;  %p2058_p7 = scmp.lt.s32.totalorder %s2052_s21, %s2052_s21 }
  0x17   :  { %p2059_p8 = por %p2058_p7, %p2057_p6 }
  0x19   :  { %p2060_p9 = pnand %p2059_p8, %p2053_p5 }
  0x1b   :  { %2063 = shalt.err (!%p2060_p9)
}
  0x1c   :  { %s2165_s22 = smov 128   ;;  %s2166_s23 = smov 8  }
  0x1d   :  { %54 = dma.hbm_to_vmem [thread:$0]  %s2558_s5, 2048, %s49_s19, [#allocation9], %s2165_s22, %s2165_s22, %s2166_s23  }
  0x1e   :  { %s2072_s26 = scalar_lea.vmem %s33_s20, 1024  ;;  %p2077_p11 = scmp.lt.s32.totalorder %s33_s20, %s33_s20 }
  0x1f   :  { %p2073_p10 = scmp.ne.s32.totalorder %s33_s20, %s2072_s26  ;;  %p2078_p12 = scmp.lt.s32.totalorder %s2072_s26, %s2072_s26 }
  0x21   :  { %p2079_p13 = por %p2078_p12, %p2077_p11 }
  0x23   :  { %p2080_p0 = pnand %p2079_p13, %p2073_p10 }
  0x25   :  { %2083 = shalt.err (!%p2080_p0)
}
  0x26   :  { %38 = dma.hbm_to_vmem [thread:$0]  %s2555_s2, 1024, %s33_s20, [#allocation6], %s2165_s22, %s2165_s22, %s2166_s23  }
  0x27   :  { %s2167_s29 = smov [#allocation10]   ;;  %s2168_s11 = smov [#allocation11]  }
  0x28   :  { %s62_s30 = sshll.u32 %s2167_s29, 4  ;;  %s74_s12 = sshll.u32 %s2168_s11, 4  ;;  %s63_s30 = int_to_ptr.vmem [resolvable:$true] %s62_s30  ;;  %s75_s12 = int_to_ptr.vmem [resolvable:$true] %s74_s12 }
  0x29   :  { %s2092_s5 = scalar_lea.vmem %s63_s30, 2048  ;;  %p2097_p2 = scmp.lt.s32.totalorder %s63_s30, %s63_s30 }
  0x2a   :  { %p2093_p1 = scmp.ne.s32.totalorder %s63_s30, %s2092_s5  ;;  %p2098_p3 = scmp.lt.s32.totalorder %s2092_s5, %s2092_s5 }
  0x2c   :  { %p2099_p4 = por %p2098_p3, %p2097_p2 }
  0x2e   :  { %p2100_p5 = pnand %p2099_p4, %p2093_p1 }
  0x30   :  { %2103 = shalt.err (!%p2100_p5)
}
  0x31   :  { %68 = dma.hbm_to_vmem [thread:$0]  %s2560_s7, 2048, %s63_s30, [#allocation9], %s2165_s22, %s2165_s22, %s2166_s23  }
  0x32   :  { %s2112_s2 = scalar_lea.vmem %s75_s12, 2048  ;;  %p2117_p7 = scmp.lt.s32.totalorder %s75_s12, %s75_s12 }
  0x33   :  { %p2113_p6 = scmp.ne.s32.totalorder %s75_s12, %s2112_s2  ;;  %p2118_p8 = scmp.lt.s32.totalorder %s2112_s2, %s2112_s2 }
  0x35   :  { %p2119_p9 = por %p2118_p8, %p2117_p7 }
  0x37   :  { %p2120_p10 = pnand %p2119_p9, %p2113_p6 }
  0x39   :  { %2123 = shalt.err (!%p2120_p10)
}
  0x3a   :  { %80 = dma.hbm_to_vmem [thread:$0]  %s2561_s8, 2048, %s75_s12, [#allocation12], %s2165_s22, %s2165_s22, %s2166_s23  }
  0x3b   :  { %2150 = dma.done.wait [#allocation6], 1024  }
  0x3c   :  { %2151 = vsyncadd [#allocation6], 4294966272 }
  0x3d   :  { %2152 = dma.done.wait [#allocation9], 4096  }
  0x3e   :  { %2153 = vsyncadd [#allocation9], 4294963200 }
  0x3f   :  { %2154 = dma.done.wait [#allocation12], 2048  }
  0x40   :  { %2155 = vsyncadd [#allocation12], 4294965248  ;;  %v2256_v0 = vld [vmem:[#allocation5] sm:$0xff]  ;;  %v2258_v1 = vld [vmem:[#allocation5 + $0x8] sm:$0xff]  ;;  %s2158_s7 = smov 0  }
  0x41   :  { %v2260_v2 = vld [vmem:[#allocation5 + $0x10] sm:$0xff]  ;;  %v2262_v3 = vld [vmem:[#allocation5 + $0x18] sm:$0xff]  ;;  %v2264_v4 = vld [vmem:[#allocation5 + $0x20] sm:$0xff] }
  0x42   :  { %v2266_v5 = vld [vmem:[#allocation5 + $0x28] sm:$0xff]  ;;  %v2268_v6 = vld [vmem:[#allocation5 + $0x30] sm:$0xff]  ;;  %v2270_v7 = vld [vmem:[#allocation5 + $0x38] sm:$0xff] }
  0x43 LB: > { %s111_s8 = sld [smem:[#allocation4 + %s2160_s7]]  ;;  %s1602_s17 = sshll.u32 %s2160_s7, 3  ;;  %s2160_s7 = sphi %s2158_s7, %s109_s7  }
  0x44   : > { %s116_s0 = scalar_lea.vmem [#allocation2], %s2160_s7  ;;  %s109_s7 = sadd.s32 1, %s2160_s7  }
  0x45   : > { %p106_p11 = scmp.ge.s32.totalorder %s109_s7, 8  }
  0x46   :  { %v227_v9 = vld [vmem:[#allocation8 + $0x78] sm:$0xff] (%p106_p11)  ;;  %v134_v10 = vld [vmem:[%s2556_s3 + $0x78] sm:$0xff] (%p106_p11)  ;;  %1811 = vmatprep.mubr.f32.mxu1 (%p106_p11), %v2256_v0  ;;  %v2169_v12 = vmov (%p106_p11), 0.0   ;;  %v133_v13 = vld [vmem:[%s2556_s3 + $0x70] sm:$0xff] (%p106_p11)  ;;  %vm2170_vm0 = vmmov (%p106_p11), 0   ;;  %v338_v61 = vlaneseq (%p106_p11)  ;;  %vm780_vm2 = vcmask (%p106_p11), 64512  }
  0x47   :  { %v226_v11 = vld [vmem:[#allocation8 + $0x70] sm:$0xff] (%p106_p11)  ;;  %1744 = vmatprep.subr.mxu0 (%p106_p11), %v2169_v12  ;;  %1779 = vmatprep.subr.mxu1 (%p106_p11), %v227_v9  ;;  %v225_v14 = vld [vmem:[#allocation8 + $0x68] sm:$0xff] (%p106_p11)  ;;  %v132_v15 = vld [vmem:[%s2556_s3 + $0x68] sm:$0xff] (%p106_p11)  ;;  %v2171_v59 = vmov (%p106_p11), 1966171168   ;;  %vm1476_vm10 = vcmask (%p106_p11), 1041409  }
  0x48   :  { %108 = sbr.rel (!%p106_p11) target bundleno = 67 (0x43), region = 81  ;;  %1745 = vmatpush3.msra.mxu0 (%p106_p11), %v134_v10  ;;  %1780 = vmatpush3.msra.mxu1 (%p106_p11), %v227_v9  ;;  %v224_v16 = vld [vmem:[#allocation8 + $0x60] sm:$0xff] (%p106_p11)  ;;  %v131_v17 = vld [vmem:[%s2556_s3 + $0x60] sm:$0xff] (%p106_p11)  ;;  %v130_v19 = vld [vmem:[%s2556_s3 + $0x58] sm:$0xff] (%p106_p11)  ;;  %v336_v60 = vunpack.c.l.s4 (%p106_p11), %v2171_v59  ;;  %v339_v63 = vshrl.u32 (%p106_p11), %v338_v61, 7  ;;  %v2172_v10 = vmov (%p106_p11), 0  }
  0x49   : > { %s113_s18 = sadd.s32 %s1602_s17, %s111_s8  ;;  %1746 = vmatprep.subr.mxu0 (%p106_p11), %v2169_v12  ;;  %1781 = vmatprep.subr.mxu1 (%p106_p11), %v226_v11  ;;  %v223_v18 = vld [vmem:[#allocation8 + $0x58] sm:$0xff] (%p106_p11)  ;;  %v222_v20 = vld [vmem:[#allocation8 + $0x50] sm:$0xff] (%p106_p11)  ;;  %v129_v21 = vld [vmem:[%s2556_s3 + $0x50] sm:$0xff] (%p106_p11)  ;;  %vm1479_vm11 = vcmask (%p106_p11), 1042434   ;;  %vm1482_vm12 = vcmask (%p106_p11), 1043459   ;;  %vm1485_vm13 = vcmask (%p106_p11), 1044484  }
  0x4a   : > { %s114_s19 = scalar_lea.vmem [#allocation5], %s113_s18  ;;  %1747 = vmatpush3.msra.mxu0 (%p106_p11), %v133_v13  ;;  %1782 = vmatpush3.msra.mxu1 (%p106_p11), %v226_v11  ;;  %v221_v22 = vld [vmem:[#allocation8 + $0x48] sm:$0xff] (%p106_p11)  ;;  %v128_v23 = vld [vmem:[%s2556_s3 + $0x48] sm:$0xff] (%p106_p11)  ;;  %v127_v25 = vld [vmem:[%s2556_s3 + $0x40] sm:$0xff] (%p106_p11)  ;;  %v337_v62 = vunpack.c.0.s8 (%p106_p11), %v336_v60  ;;  %vm1488_vm14 = vcmask (%p106_p11), 1045509   ;;  %vm1491_vm15 = vcmask (%p106_p11), 1046534  }
  0x4b   : > { %v115_v8 = vld [vmem:[%s114_s19] sm:$0x1]  ;;  %1748 = vmatprep.subr.mxu0 (%p106_p11), %v2169_v12  ;;  %1783 = vmatprep.subr.mxu1 (%p106_p11), %v225_v14  ;;  %v220_v24 = vld [vmem:[#allocation8 + $0x40] sm:$0xff] (%p106_p11)  ;;  %v126_v27 = vld [vmem:[%s2556_s3 + $0x38] sm:$0xff] (%p106_p11)  ;;  %s2173_s14 = smov (%p106_p11), [#allocation13]  }
  0x4c   : > { %117 = vst [vmem:[%s116_s0] sm:$0x1] %v115_v8  ;;  %1749 = vmatpush3.msra.mxu0 (%p106_p11), %v132_v15  ;;  %1784 = vmatpush3.msra.mxu1 (%p106_p11), %v225_v14  ;;  %v219_v26 = vld [vmem:[#allocation8 + $0x38] sm:$0xff] (%p106_p11)  ;;  %v218_v28 = vld [vmem:[#allocation8 + $0x30] sm:$0xff] (%p106_p11)  ;;  %v125_v29 = vld [vmem:[%s2556_s3 + $0x30] sm:$0xff] (%p106_p11)  ;;  %v2402_v8 = vsub.s32 (%p106_p11), %v337_v62, %v339_v63  ;;  %s1582_s2 = sshll.u32 (%p106_p11), %s2173_s14, 4  ;;  %s1583_s2 = int_to_ptr.vmem [resolvable:$true] %s1582_s2 }
  0x4d   :  { %1750 = vmatprep.subr.mxu0 %v2169_v12  ;;  %1785 = vmatprep.subr.mxu1 %v224_v16  ;;  %v217_v30 = vld [vmem:[#allocation8 + $0x28] sm:$0xff]  ;;  %v124_v31 = vld [vmem:[%s2556_s3 + $0x28] sm:$0xff]  ;;  %v123_v33 = vld [vmem:[%s2556_s3 + $0x20] sm:$0xff]  ;;  %s2124_s15 = scalar_lea.vmem %s1583_s2, 128  ;;  %p2129_p13 = scmp.lt.s32.totalorder %s1583_s2, %s1583_s2 }
  0x4e   :  { %1751 = vmatpush3.msra.mxu0 %v131_v17  ;;  %1786 = vmatpush3.msra.mxu1 %v224_v16  ;;  %v216_v32 = vld [vmem:[#allocation8 + $0x20] sm:$0xff]  ;;  %v215_v34 = vld [vmem:[#allocation8 + $0x18] sm:$0xff]  ;;  %v122_v35 = vld [vmem:[%s2556_s3 + $0x18] sm:$0xff]  ;;  %p2125_p12 = scmp.ne.s32.totalorder %s1583_s2, %s2124_s15  ;;  %p2130_p0 = scmp.lt.s32.totalorder %s2124_s15, %s2124_s15 }
  0x4f   :  { %1752 = vmatprep.subr.mxu0 %v2169_v12  ;;  %1787 = vmatprep.subr.mxu1 %v223_v18  ;;  %v214_v36 = vld [vmem:[#allocation8 + $0x10] sm:$0xff]  ;;  %v121_v37 = vld [vmem:[%s2556_s3 + $0x10] sm:$0xff]  ;;  %v120_v39 = vld [vmem:[%s2556_s3 + $0x8] sm:$0xff] }
  0x50   :  { %1753 = vmatpush3.msra.mxu0 %v130_v19  ;;  %1788 = vmatpush3.msra.mxu1 %v223_v18  ;;  %v213_v38 = vld [vmem:[#allocation8 + $0x8] sm:$0xff]  ;;  %v212_v40 = vld [vmem:[#allocation8] sm:$0xff]  ;;  %v119_v41 = vld [vmem:[%s2556_s3] sm:$0xff]  ;;  %p2131_p1 = por %p2130_p0, %p2129_p13 }
  0x51   :  { %1754 = vmatprep.subr.mxu0 %v2169_v12  ;;  %1789 = vmatprep.subr.mxu1 %v222_v20  ;;  %v494_v43 = vld [vmem:[%s2559_s6 + $0x78] sm:$0xff]  ;;  %v493_v44 = vld [vmem:[%s2559_s6 + $0x70] sm:$0xff]  ;;  %v492_v45 = vld [vmem:[%s2559_s6 + $0x68] sm:$0xff] }
  0x52   :  { %1755 = vmatpush3.msra.mxu0 %v129_v21  ;;  %1790 = vmatpush3.msra.mxu1 %v222_v20  ;;  %v491_v46 = vld [vmem:[%s2559_s6 + $0x60] sm:$0xff]  ;;  %v490_v47 = vld [vmem:[%s2559_s6 + $0x58] sm:$0xff]  ;;  %v489_v48 = vld [vmem:[%s2559_s6 + $0x50] sm:$0xff]  ;;  %p2132_p2 = pnand %p2131_p1, %p2125_p12 }
  0x53   :  { %1756 = vmatprep.subr.mxu0 %v2169_v12  ;;  %1791 = vmatprep.subr.mxu1 %v221_v22  ;;  %v2336_v42 = vld [vmem:[#allocation2] sm:$0xff]  ;;  %v488_v49 = vld [vmem:[%s2559_s6 + $0x48] sm:$0xff]  ;;  %v486_v51 = vld [vmem:[%s2559_s6 + $0x38] sm:$0xff] }
  0x54   :  { %1757 = vmatpush3.msra.mxu0 %v128_v23  ;;  %1792 = vmatpush3.msra.mxu1 %v221_v22  ;;  %v487_v50 = vld [vmem:[%s2559_s6 + $0x40] sm:$0xff]  ;;  %v485_v52 = vld [vmem:[%s2559_s6 + $0x30] sm:$0xff]  ;;  %v484_v53 = vld [vmem:[%s2559_s6 + $0x28] sm:$0xff]  ;;  %v2423_v23 = vsub.s32 0, %v339_v63 }
  0x55   :  { %1758 = vmatprep.subr.mxu0 %v2169_v12  ;;  %1793 = vmatprep.subr.mxu1 %v220_v24  ;;  %v483_v54 = vld [vmem:[%s2559_s6 + $0x20] sm:$0xff]  ;;  %v482_v55 = vld [vmem:[%s2559_s6 + $0x18] sm:$0xff]  ;;  %v481_v56 = vld [vmem:[%s2559_s6 + $0x10] sm:$0xff] }
  0x56   :  { %1759 = vmatpush3.msra.mxu0 %v127_v25  ;;  %1794 = vmatpush3.msra.mxu1 %v220_v24  ;;  %v480_v57 = vld [vmem:[%s2559_s6 + $0x8] sm:$0xff]  ;;  %v479_v58 = vld [vmem:[%s2559_s6] sm:$0xff] }
  0x57   :  { %1760 = vmatprep.subr.mxu0 %v2169_v12  ;;  %1795 = vmatprep.subr.mxu1 %v219_v26  ;;  %v2407_v9 = vld [vmem:[%s2554_s1] sm:$0xff] }
  0x58   :  { %1761 = vmatpush3.msra.mxu0 %v126_v27  ;;  %1796 = vmatpush3.msra.mxu1 %v219_v26  ;;  %v658_v11 = vrot.slane %v2407_v9, %v2402_v8  ;;  %v1603_v16 = vld [vmem:[%s2557_s4] ss:$0 sm:$0xff] }
  0x59   :  { %1762 = vmatprep.subr.mxu0 %v2169_v12  ;;  %1797 = vmatprep.subr.mxu1 %v218_v28 }
  0x5a   :  { %1763 = vmatpush3.msra.mxu0 %v125_v29  ;;  %1798 = vmatpush3.msra.mxu1 %v218_v28  ;;  %v666_v13 = vcombine.high %v658_v11, %v658_v11  ;;  %v2412_v14 = vrot.slane %v658_v11, %v2402_v8 }
  0x5b   :  { %1764 = vmatprep.subr.mxu0 %v2169_v12  ;;  %1799 = vmatprep.subr.mxu1 %v217_v30 }
  0x5c   :  { %1765 = vmatpush3.msra.mxu0 %v124_v31  ;;  %1800 = vmatpush3.msra.mxu1 %v217_v30  ;;  %v2415_v15 = vrot.slane %v666_v13, %v2402_v8 }
  0x5d   :  { %1766 = vmatprep.subr.mxu0 %v2169_v12  ;;  %1801 = vmatprep.subr.mxu1 %v216_v32 }
  0x5e   :  { %1767 = vmatpush3.msra.mxu0 %v123_v33  ;;  %1802 = vmatpush3.msra.mxu1 %v216_v32 }
  0x5f   :  { %1768 = vmatprep.subr.mxu0 %v2169_v12  ;;  %1803 = vmatprep.subr.mxu1 %v215_v34 }
  0x60   :  { %1769 = vmatpush3.msra.mxu0 %v122_v35  ;;  %1804 = vmatpush3.msra.mxu1 %v215_v34 }
  0x61   :  { %1770 = vmatprep.subr.mxu0 %v2169_v12  ;;  %1805 = vmatprep.subr.mxu1 %v214_v36 }
  0x62   :  { %1771 = vmatpush3.msra.mxu0 %v121_v37  ;;  %1806 = vmatpush3.msra.mxu1 %v214_v36 }
  0x63   :  { %1772 = vmatprep.subr.mxu0 %v2169_v12  ;;  %1807 = vmatprep.subr.mxu1 %v213_v38 }
  0x64   :  { %1773 = vmatpush3.msra.mxu0 %v120_v39  ;;  %1808 = vmatpush3.msra.mxu1 %v213_v38 }
  0x65   :  { %1774 = vmatprep.subr.mxu0 %v2169_v12  ;;  %1809 = vmatprep.subr.mxu1 %v212_v40 }
  0x66   :  { %1775 = vmatpush3.msra.mxu0 %v119_v41  ;;  %1776 = vmatprep.mubr.msk.f32.mxu0 %vm2170_vm0, %v2169_v12 }
  0x67   :  { %1810 = vmatpush3.msra.mxu1 %v212_v40  ;;  %1777 = vmatmul.mubr.f32.vlgmr.msra.gmra.mxu0 %v2336_v42 }
  0x68   :  { %1812 = vmatmul.mubr.f32.vlgmr.msra.gmra.mxu1 %v2258_v1  ;;  %1867 = vmatprep.subr.mxu1 %v2169_v12 }
  0x69   :  { %1814 = vmatprep.mubr.f32.mxu1 %v2260_v2  ;;  %1823 = vmatprep.subr.mxu0 %v494_v43 }
  0x6a   :  { %1824 = vmatpush3.msra.mxu0 %v494_v43  ;;  %1998 = vset.pattern.permute.xlu1 %v2172_v10 }
  0x6b   :  { %1825 = vmatprep.subr.mxu0 %v493_v44  ;;  %1997 = vset.pattern.permute.xlu0 %v2172_v10 }
  0x6c   :  { %1815 = vmatmul.mubr.f32.gmra.mxu1 %v2262_v3  ;;  %1826 = vmatpush3.msra.mxu0 %v493_v44 }
  0x6d   :  { %1817 = vmatprep.mubr.f32.mxu1 %v2264_v4  ;;  %1827 = vmatprep.subr.mxu0 %v492_v45 }
  0x6e   :  { %1828 = vmatpush3.msra.mxu0 %v492_v45  ;;  %701 = vperm.xlu0 %1997, %v2412_v14  }
  0x6f   :  { %1829 = vmatprep.subr.mxu0 %v491_v46  ;;  %708 = vperm.xlu1 %1998, %v2415_v15  }
  0x70   :  { %1818 = vmatmul.mubr.f32.gmra.mxu1 %v2266_v5  ;;  %1830 = vmatpush3.msra.mxu0 %v491_v46 }
  0x71   :  { %1820 = vmatprep.mubr.f32.mxu1 %v2268_v6  ;;  %1831 = vmatprep.subr.mxu0 %v490_v47 }
  0x72   :  { %1832 = vmatpush3.msra.mxu0 %v490_v47 }
  0x73   :  { %1833 = vmatprep.subr.mxu0 %v489_v48 }
  0x74   :  { %1821 = vmatmul.mubr.f32.gmra.mxu1 %v2270_v7  ;;  %1834 = vmatpush3.msra.mxu0 %v489_v48 }
  0x75   :  { %1869 = vmatprep.mubr.msk.f32.mxu1 %vm2170_vm0, %v2169_v12  ;;  %1835 = vmatprep.subr.mxu0 %v488_v49 }
  0x76   :  { %1836 = vmatpush3.msra.mxu0 %v488_v49 }
  0x77   :  { %1837 = vmatprep.subr.mxu0 %v487_v50 }
  0x78   :  { %1838 = vmatpush3.msra.mxu0 %v487_v50 }
  0x79   :  { %1839 = vmatprep.subr.mxu0 %v486_v51 }
  0x7a   :  { %1840 = vmatpush3.msra.mxu0 %v486_v51 }
  0x7b   :  { %1841 = vmatprep.subr.mxu0 %v485_v52 }
  0x7c   :  { %1842 = vmatpush3.msra.mxu0 %v485_v52 }
  0x7d   :  { %1843 = vmatprep.subr.mxu0 %v484_v53 }
  0x7e   :  { %1844 = vmatpush3.msra.mxu0 %v484_v53 }
  0x7f   :  { %1845 = vmatprep.subr.mxu0 %v483_v54 }
  0x80   :  { %1846 = vmatpush3.msra.mxu0 %v483_v54 }
  0x81   :  { %1847 = vmatprep.subr.mxu0 %v482_v55 }
  0x82   :  { %1848 = vmatpush3.msra.mxu0 %v482_v55 }
  0x83   :  { %1849 = vmatprep.subr.mxu0 %v481_v56 }
  0x84   :  { %1850 = vmatpush3.msra.mxu0 %v481_v56 }
  0x85   :  { %1851 = vmatprep.subr.mxu0 %v480_v57 }
  0x86   :  { %1852 = vmatpush3.msra.mxu0 %v480_v57 }
  0x87   :  { %1853 = vmatprep.subr.mxu0 %v479_v58 }
  0x88   :  { %1854 = vmatpush3.msra.mxu0 %v479_v58 }
  0x89   :  { %1907 = vmatprep.subr.mxu0 %v2169_v12 }
 0x127   :  { %v208_v17 = vpop.f32.mrf.mxu0 }
 0x128   :  { %v209_v18 = vadd.f32 %v1603_v16, %v208_v17  ;;  %v1813_v19 = vpop.f32.mrf.mxu1 }
 0x129   :  { %v1778_v20 = vpop.f32.mrf.mxu0 }
 0x12a   :  { %v334_v21 = vcombine.high %v209_v18, %v209_v18  ;;  %v341_v22 = vrot.slane %v209_v18, %v2402_v8  ;;  %v294_v24 = vpop.f32.mrf.mxu1 }
 0x12c   :  { %v348_v25 = vrot.slane %v334_v21, %v2402_v8  ;;  %v349_v26 = vcombine.high %v341_v22, %v341_v22  ;;  %v357_v27 = vrot.slane %v341_v22, %v2402_v8  ;;  %v1816_v28 = vpop.f32.mrf.mxu1 }
 0x12e   :  { %v371_v29 = vrot.slane %v349_v26, %v2402_v8  ;;  %v386_v30 = vrot.slane %v357_v27, %v2423_v23  ;;  %v304_v31 = vpop.f32.mrf.mxu1  ;;  %v379_v32 = vcombine.high %v357_v27, %v357_v27  ;;  %v350_v33 = vcombine.high %v348_v25, %v348_v25 }
 0x12f   :  { %v364_v34 = vrot.slane %v348_v25, %v2402_v8 }
 0x130   :  { %v390_v35 = vrot.slane %v371_v29, %v2423_v23  ;;  %v423_v36 = vadd.f32 %v386_v30, %v294_v24  ;;  %v381_v37 = vcombine.high %v371_v29, %v371_v29  ;;  %v394_v38 = vrot.slane %v379_v32, %v2423_v23  ;;  %v1819_v39 = vpop.f32.mrf.mxu1 }
 0x131   :  { %v378_v40 = vrot.slane %v350_v33, %v2402_v8  ;;  %v402_v41 = vrot.slane %v364_v34, %v2423_v23  ;;  %v380_v43 = vcombine.high %v364_v34, %v364_v34 }
 0x132   :  { %v424_v44 = vadd.f32 %v1813_v19, %v390_v35  ;;  %v1604_v45 = vmul.f32 -1.442695, %v423_v36  ;;  %v398_v46 = vrot.slane %v381_v37, %v2423_v23  ;;  %v425_v47 = vadd.f32 %v394_v38, %v304_v31  ;;  %v314_v48 = vpop.f32.mrf.mxu1 }
 0x133   :  { %v406_v49 = vrot.slane %v378_v40, %v2423_v23  ;;  %v427_v50 = vadd.f32 %v402_v41, %v314_v48  ;;  %v382_v51 = vcombine.high %v378_v40, %v378_v40  ;;  %v410_v58 = vrot.slane %v380_v43, %v2423_v23 }
 0x134   :  { %v1605_v52 = vmul.f32 -1.442695, %v424_v44  ;;  %2000 = vpow2.f32 %v1604_v45  ;;  %v426_v53 = vadd.f32 %v1816_v28, %v398_v46  ;;  %v1606_v54 = vmul.f32 -1.442695, %v425_v47  ;;  %v1822_v55 = vpop.f32.mrf.mxu1 }
 0x135   :  { %v428_v56 = vadd.f32 %v1819_v39, %v406_v49  ;;  %v414_v57 = vrot.slane %v382_v51, %v2423_v23  ;;  %v1608_v60 = vmul.f32 -1.442695, %v427_v50  ;;  %v651_v45 = vcombine.high %v2407_v9, %v2407_v9 }
 0x136   :  { %2002 = vpow2.f32 %v1605_v52  ;;  %v1607_v59 = vmul.f32 -1.442695, %v426_v53  ;;  %v324_v62 = vpop.f32.mrf.mxu1  ;;  %v696_v46 = vcombine.high %v2412_v14, %v2412_v14  ;;  %v698_v49 = vcombine.high %v2415_v15, %v2415_v15 }
 0x137   :  { %2004 = vpow2.f32 %v1606_v54  ;;  %v1609_v63 = vmul.f32 -1.442695, %v428_v56  ;;  %v430_v10 = vadd.f32 %v1822_v55, %v414_v57  ;;  %v429_v11 = vadd.f32 %v410_v58, %v324_v62  ;;  %v702_v57 = vpop.permute.xlu0 %701  ;;  %v709_v58 = vpop.permute.xlu1 %708 }
 0x138   :  { %2006 = vpow2.f32 %v1607_v59  ;;  %v665_v50 = vrot.slane %v651_v45, %v2402_v8  ;;  %v2450_v59 = vand.u32 127, %v338_v61  ;;  %v713_v62 = vrot.slane %v709_v58, %v2423_v23  ;;  %v1393_v45 = vld [vmem:[#allocation11 + $0x60] sm:$0xff] }
 0x139   :  { %2008 = vpow2.f32 %v1609_v63  ;;  %v1610_v13 = vmul.f32 -1.442695, %v429_v11  ;;  %v1611_v16 = vmul.f32 -1.442695, %v430_v10  ;;  %v1385_v58 = vld [vmem:[#allocation11 + $0x20] sm:$0xff] }
 0x13a   :  { %2010 = vpow2.f32 %v1608_v60  ;;  %v681_v52 = vrot.slane %v665_v50, %v2402_v8  ;;  %v667_v53 = vcombine.high %v665_v50, %v665_v50  ;;  %v706_v60 = vrot.slane %v702_v57, %v2423_v23  ;;  %v1375_v50 = vld [vmem:[#allocation10 + $0x50] sm:$0xff]  ;;  %v1370_v57 = vld [vmem:[#allocation10 + $0x28] sm:$0xff] }
 0x13b   :  { %2012 = vpow2.f32 %v1610_v13  ;;  %vm757_vm3 = vcmp.lt.s32.totalorder %v2450_v59, %v713_v62  ;;  %v1368_v62 = vld [vmem:[#allocation10 + $0x18] sm:$0xff] }
 0x13c   :  { %2014 = vpow2.f32 %v1611_v16  ;;  %v695_v14 = vrot.slane %v667_v53, %v2402_v8  ;;  %v697_v55 = vcombine.high %v681_v52, %v681_v52  ;;  %vm756_vm1 = vcmp.lt.s32.totalorder %v2450_v59, %v706_v60  ;;  %v1389_v53 = vld [vmem:[#allocation11 + $0x40] sm:$0xff]  ;;  %v1384_v60 = vld [vmem:[#allocation11 + $0x18] sm:$0xff] }
 0x13d   :  { %v1612_v11 = vsel %vm756_vm1, 1.0, %v2169_v12 }
 0x13e   :  { %v699_v56 = vcombine.high %v695_v14, %v695_v14 }
 0x141   :  { %v2001_v17 = vpop.eup %2000 }
 0x142   :  { %v455_v18 = vadd.f32 1.0, %v2001_v17 }
 0x143   :  { %v2003_v19 = vpop.eup %2002 }
 0x144   :  { %v2005_v20 = vpop.eup %2004  ;;  %v456_v21 = vadd.f32 1.0, %v2003_v19  ;;  %2016 = vrcp.f32 %v455_v18 }
 0x145   :  { %v2007_v22 = vpop.eup %2006  ;;  %v457_v24 = vadd.f32 1.0, %v2005_v20 }
 0x146   :  { %v2009_v25 = vpop.eup %2008  ;;  %2018 = vrcp.f32 %v456_v21  ;;  %v458_v26 = vadd.f32 1.0, %v2007_v22 }
 0x147   :  { %v2011_v27 = vpop.eup %2010  ;;  %2020 = vrcp.f32 %v457_v24  ;;  %v460_v30 = vadd.f32 1.0, %v2009_v25 }
 0x148   :  { %v459_v28 = vadd.f32 1.0, %v2011_v27  ;;  %v2013_v29 = vpop.eup %2012  ;;  %2022 = vrcp.f32 %v458_v26 }
 0x149   :  { %v2015_v31 = vpop.eup %2014  ;;  %v461_v32 = vadd.f32 1.0, %v2013_v29 }
 0x14a   :  { %2024 = vrcp.f32 %v459_v28  ;;  %v462_v33 = vadd.f32 1.0, %v2015_v31 }
 0x14b   :  { %2026 = vrcp.f32 %v460_v30 }
 0x14c   :  { %2028 = vrcp.f32 %v461_v32 }
 0x14d   :  { %2030 = vrcp.f32 %v462_v33 }
 0x151   :  { %v2017_v34 = vpop.eup %2016 }
 0x152   :  { %1855 = vmatprep.mubr.f32.mxu0 %v2017_v34 }
 0x153   :  { %v2019_v35 = vpop.eup %2018 }
 0x154   :  { %v2021_v36 = vpop.eup %2020  ;;  %1856 = vmatmul.mubr.f32.vlgmr.msra.gmra.mxu0 %v2019_v35 }
 0x155   :  { %1858 = vmatprep.mubr.f32.mxu0 %v2021_v36  ;;  %v2023_v37 = vpop.eup %2022 }
 0x157   :  { %v2025_v38 = vpop.eup %2024 }
 0x158   :  { %1859 = vmatmul.mubr.f32.gmra.mxu0 %v2023_v37  ;;  %v2027_v39 = vpop.eup %2026 }
 0x159   :  { %1861 = vmatprep.mubr.f32.mxu0 %v2025_v38  ;;  %v2029_v40 = vpop.eup %2028 }
 0x15a   :  { %v2031_v41 = vpop.eup %2030 }
 0x15c   :  { %1862 = vmatmul.mubr.f32.gmra.mxu0 %v2027_v39  ;;  %v1380_v39 = vld [vmem:[#allocation10 + $0x78] sm:$0xff] }
 0x15d   :  { %1864 = vmatprep.mubr.f32.mxu0 %v2029_v40  ;;  %v1395_v40 = vld [vmem:[#allocation11 + $0x70] sm:$0xff] }
 0x160   :  { %1865 = vmatmul.mubr.f32.gmra.mxu0 %v2031_v41  ;;  %v1379_v41 = vld [vmem:[#allocation10 + $0x70] sm:$0xff] }
 0x161   :  { %1939 = vmatprep.mubr.msk.f32.mxu0 %vm2170_vm0, %v2169_v12 }
 0x214   :  { %v1857_v43 = vpop.f32.mrf.mxu0 }
 0x215   :  { %607 = vperm.xlu1 %1998, %v1857_v43   ;;  %v1394_v43 = vld [vmem:[#allocation11 + $0x68] sm:$0xff] }
 0x216   :  { %v561_v44 = vpop.f32.mrf.mxu0 }
 0x217   :  { %602 = vperm.xlu0 %1997, %v561_v44   ;;  %v1378_v44 = vld [vmem:[#allocation10 + $0x68] sm:$0xff] }
 0x218   :  { %v1860_v47 = vpop.f32.mrf.mxu0 }
 0x21a   :  { %v571_v48 = vpop.f32.mrf.mxu0 }
 0x21b   :  { %715 = vperm.xlu0 %1997, %v696_v46   ;;  %612 = vperm.xlu1 %1998, %v571_v48   ;;  %v1377_v46 = vld [vmem:[#allocation10 + $0x60] sm:$0xff]  ;;  %v1376_v48 = vld [vmem:[#allocation10 + $0x58] sm:$0xff] }
 0x21c   :  { %v1863_v51 = vpop.f32.mrf.mxu0 }
 0x21e   :  { %v581_v9 = vpop.f32.mrf.mxu0 }
 0x21f   :  { %722 = vperm.xlu0 %1997, %v698_v49   ;;  %617 = vperm.xlu1 %1998, %v1860_v47   ;;  %v1392_v47 = vld [vmem:[#allocation11 + $0x58] sm:$0xff]  ;;  %v1391_v49 = vld [vmem:[#allocation11 + $0x50] sm:$0xff] }
 0x220   :  { %v1866_v54 = vpop.f32.mrf.mxu0 }
 0x222   :  { %v591_v15 = vpop.f32.mrf.mxu0 }
 0x223   :  { %729 = vperm.xlu0 %1997, %v681_v52   ;;  %622 = vperm.xlu1 %1998, %v581_v9   ;;  %v1374_v52 = vld [vmem:[#allocation10 + $0x48] sm:$0xff]  ;;  %v1373_v9 = vld [vmem:[#allocation10 + $0x40] sm:$0xff] }
 0x227   :  { %736 = vperm.xlu0 %1997, %v695_v14   ;;  %627 = vperm.xlu1 %1998, %v1863_v51   ;;  %v1390_v51 = vld [vmem:[#allocation11 + $0x48] sm:$0xff]  ;;  %v1388_v14 = vld [vmem:[#allocation11 + $0x38] sm:$0xff] }
 0x22b   :  { %743 = vperm.xlu0 %1997, %v697_v55   ;;  %632 = vperm.xlu1 %1998, %v591_v15   ;;  %v1387_v55 = vld [vmem:[#allocation11 + $0x30] sm:$0xff] }
 0x22c   :  { %v1371_v15 = vld [vmem:[#allocation10 + $0x30] sm:$0xff] }
 0x22f   :  { %750 = vperm.xlu0 %1997, %v699_v56   ;;  %637 = vperm.xlu1 %1998, %v1866_v54   ;;  %v1372_v54 = vld [vmem:[#allocation10 + $0x38] sm:$0xff]  ;;  %v1386_v56 = vld [vmem:[#allocation11 + $0x28] sm:$0xff] }
 0x290   :  { %v608_v8 = vpop.permute.xlu1 %607 }
 0x291   :  { %v641_v13 = vmul.f32 %v608_v8, %v2258_v1  ;;  %v1383_v8 = vld [vmem:[#allocation11 + $0x10] sm:$0xff] }
 0x292   :  { %v603_v63 = vpop.permute.xlu0 %602 }
 0x293   :  { %v640_v10 = vmul.f32 %v603_v63, %v2256_v0  ;;  %v1613_v0 = vsel %vm757_vm3, 1.0, %v2169_v12  ;;  %v1367_v63 = vld [vmem:[#allocation10 + $0x10] sm:$0xff] }
 0x295   :  { %1868 = vmatpush3.msra.mxu1 %v640_v10  ;;  %v1382_v10 = vld [vmem:[#allocation11 + $0x8] sm:$0xff] }
 0x296   :  { %1870 = vmatmul.mubr.msk.f32.vlgmr.msra.gmra.mxu1 %vm780_vm2, %v1612_v11  ;;  %1872 = vmatprep.subr.mxu1 %v2169_v12  ;;  %v716_v61 = vpop.permute.xlu0 %715  ;;  %v613_v16 = vpop.permute.xlu1 %612  ;;  %v1366_v11 = vld [vmem:[#allocation10 + $0x8] sm:$0xff] }
 0x297   :  { %v720_v17 = vrot.slane %v716_v61, %v2423_v23  ;;  %v642_v18 = vmul.f32 %v613_v16, %v2260_v2  ;;  %1873 = vmatpush3.msra.mxu1 %v641_v13  ;;  %1874 = vmatprep.mubr.msk.f32.mxu1 %vm2170_vm0, %v2169_v12  ;;  %v1381_v13 = vld [vmem:[#allocation11] sm:$0xff] }
 0x298   :  { %1877 = vmatprep.subr.mxu1 %v2169_v12  ;;  %v1365_v61 = vld [vmem:[#allocation10] sm:$0xff] }
 0x299   :  { %vm758_vm4 = vcmp.lt.s32.totalorder %v2450_v59, %v720_v17 }
 0x29a   :  { %1875 = vmatmul.mubr.msk.f32.vlgmr.msra.gmra.mxu1 %vm780_vm2, %v1613_v0  ;;  %v723_v1 = vpop.permute.xlu0 %722  ;;  %v618_v19 = vpop.permute.xlu1 %617  ;;  %v1614_v2 = vsel %vm758_vm4, 1.0, %v2169_v12 }
 0x29b   :  { %v727_v20 = vrot.slane %v723_v1, %v2423_v23  ;;  %1878 = vmatpush3.msra.mxu1 %v642_v18  ;;  %v643_v21 = vmul.f32 %v618_v19, %v2262_v3  ;;  %1879 = vmatprep.mubr.msk.f32.mxu1 %vm2170_vm0, %v2169_v12 }
 0x29c   :  { %1882 = vmatprep.subr.mxu1 %v2169_v12 }
 0x29d   :  { %vm759_vm5 = vcmp.lt.s32.totalorder %v2450_v59, %v727_v20 }
 0x29e   :  { %v730_v22 = vpop.permute.xlu0 %729  ;;  %1880 = vmatmul.mubr.msk.f32.vlgmr.msra.gmra.mxu1 %vm780_vm2, %v1614_v2  ;;  %v623_v24 = vpop.permute.xlu1 %622  ;;  %v1615_v3 = vsel %vm759_vm5, 1.0, %v2169_v12 }
 0x29f   :  { %v734_v25 = vrot.slane %v730_v22, %v2423_v23  ;;  %1883 = vmatpush3.msra.mxu1 %v643_v21  ;;  %v644_v26 = vmul.f32 %v623_v24, %v2264_v4  ;;  %1884 = vmatprep.mubr.msk.f32.mxu1 %vm2170_vm0, %v2169_v12 }
 0x2a0   :  { %1887 = vmatprep.subr.mxu1 %v2169_v12 }
 0x2a1   :  { %vm760_vm6 = vcmp.lt.s32.totalorder %v2450_v59, %v734_v25 }
 0x2a2   :  { %v737_v27 = vpop.permute.xlu0 %736  ;;  %1885 = vmatmul.mubr.msk.f32.vlgmr.msra.gmra.mxu1 %vm780_vm2, %v1615_v3  ;;  %v628_v28 = vpop.permute.xlu1 %627  ;;  %v1616_v4 = vsel %vm760_vm6, 1.0, %v2169_v12 }
 0x2a3   :  { %v741_v29 = vrot.slane %v737_v27, %v2423_v23  ;;  %1888 = vmatpush3.msra.mxu1 %v644_v26  ;;  %v645_v30 = vmul.f32 %v628_v28, %v2266_v5  ;;  %1889 = vmatprep.mubr.msk.f32.mxu1 %vm2170_vm0, %v2169_v12 }
 0x2a4   :  { %1892 = vmatprep.subr.mxu1 %v2169_v12 }
 0x2a5   :  { %vm761_vm7 = vcmp.lt.s32.totalorder %v2450_v59, %v741_v29 }
 0x2a6   :  { %v744_v31 = vpop.permute.xlu0 %743  ;;  %1890 = vmatmul.mubr.msk.f32.vlgmr.msra.gmra.mxu1 %vm780_vm2, %v1616_v4  ;;  %v633_v32 = vpop.permute.xlu1 %632  ;;  %v1617_v5 = vsel %vm761_vm7, 1.0, %v2169_v12 }
 0x2a7   :  { %v748_v33 = vrot.slane %v744_v31, %v2423_v23  ;;  %1893 = vmatpush3.msra.mxu1 %v645_v30  ;;  %v646_v34 = vmul.f32 %v633_v32, %v2268_v6  ;;  %1894 = vmatprep.mubr.msk.f32.mxu1 %vm2170_vm0, %v2169_v12 }
 0x2a8   :  { %1897 = vmatprep.subr.mxu1 %v2169_v12 }
 0x2a9   :  { %vm762_vm8 = vcmp.lt.s32.totalorder %v2450_v59, %v748_v33 }
 0x2aa   :  { %v751_v35 = vpop.permute.xlu0 %750  ;;  %1895 = vmatmul.mubr.msk.f32.vlgmr.msra.gmra.mxu1 %vm780_vm2, %v1617_v5  ;;  %v638_v36 = vpop.permute.xlu1 %637  ;;  %v1618_v6 = vsel %vm762_vm8, 1.0, %v2169_v12 }
 0x2ab   :  { %v755_v37 = vrot.slane %v751_v35, %v2423_v23  ;;  %1898 = vmatpush3.msra.mxu1 %v646_v34  ;;  %v647_v38 = vmul.f32 %v638_v36, %v2270_v7  ;;  %1899 = vmatprep.mubr.msk.f32.mxu1 %vm2170_vm0, %v2169_v12  ;;  %v1396_v7 = vld [vmem:[#allocation11 + $0x78] sm:$0xff] }
 0x2ac   :  { %1902 = vmatprep.subr.mxu1 %v2169_v12  ;;  %1908 = vmatpush3.msra.mxu0 %v1396_v7 }
 0x2ad   :  { %vm763_vm9 = vcmp.lt.s32.totalorder %v2450_v59, %v755_v37  ;;  %1909 = vmatprep.subr.mxu0 %v2169_v12  ;;  %v1369_v59 = vld [vmem:[#allocation10 + $0x20] sm:$0xff] }
 0x2ae   :  { %1900 = vmatmul.mubr.msk.f32.vlgmr.msra.gmra.mxu1 %vm780_vm2, %v1618_v6  ;;  %v1619_v23 = vsel %vm763_vm9, 1.0, %v2169_v12  ;;  %1910 = vmatpush3.msra.mxu0 %v1395_v40 }
 0x2af   :  { %1903 = vmatpush3.msra.mxu1 %v647_v38  ;;  %1904 = vmatprep.mubr.msk.f32.mxu1 %vm2170_vm0, %v2169_v12 }
 0x2b0   :  { %1942 = vmatprep.subr.mxu1 %v2169_v12  ;;  %1911 = vmatprep.subr.mxu0 %v2169_v12 }
 0x2b1   :  { %1912 = vmatpush3.msra.mxu0 %v1394_v43 }
 0x2b2   :  { %1905 = vmatmul.mubr.msk.f32.vlgmr.msra.gmra.mxu1 %vm780_vm2, %v1619_v23  ;;  %1913 = vmatprep.subr.mxu0 %v2169_v12 }
 0x2b3   :  { %1974 = vmatprep.mubr.msk.f32.mxu1 %vm2170_vm0, %v2169_v12  ;;  %1943 = vmatpush3.msra.mxu1 %v1380_v39  ;;  %vm1494_vm0 = vcmask 1047559   ;;  %v1628_v39 = vld [vmem:[%s2562_s9] ss:$0 sm:$0xff] }
 0x2b4   :  { %1944 = vmatprep.subr.mxu1 %v2169_v12  ;;  %1914 = vmatpush3.msra.mxu0 %v1393_v45 }
 0x2b5   :  { %1945 = vmatpush3.msra.mxu1 %v1379_v41  ;;  %1915 = vmatprep.subr.mxu0 %v2169_v12 }
 0x2b6   :  { %1946 = vmatprep.subr.mxu1 %v2169_v12  ;;  %1916 = vmatpush3.msra.mxu0 %v1392_v47 }
 0x2b7   :  { %1947 = vmatpush3.msra.mxu1 %v1378_v44  ;;  %1917 = vmatprep.subr.mxu0 %v2169_v12 }
 0x2b8   :  { %1948 = vmatprep.subr.mxu1 %v2169_v12  ;;  %1918 = vmatpush3.msra.mxu0 %v1391_v49 }
 0x2b9   :  { %1949 = vmatpush3.msra.mxu1 %v1377_v46  ;;  %1919 = vmatprep.subr.mxu0 %v2169_v12 }
 0x2ba   :  { %1950 = vmatprep.subr.mxu1 %v2169_v12  ;;  %1920 = vmatpush3.msra.mxu0 %v1390_v51 }
 0x2bb   :  { %1951 = vmatpush3.msra.mxu1 %v1376_v48  ;;  %1921 = vmatprep.subr.mxu0 %v2169_v12 }
 0x2bc   :  { %1952 = vmatprep.subr.mxu1 %v2169_v12  ;;  %1922 = vmatpush3.msra.mxu0 %v1389_v53 }
 0x2bd   :  { %1953 = vmatpush3.msra.mxu1 %v1375_v50  ;;  %1923 = vmatprep.subr.mxu0 %v2169_v12 }
 0x2be   :  { %1954 = vmatprep.subr.mxu1 %v2169_v12  ;;  %1924 = vmatpush3.msra.mxu0 %v1388_v14 }
 0x2bf   :  { %1955 = vmatpush3.msra.mxu1 %v1374_v52  ;;  %1925 = vmatprep.subr.mxu0 %v2169_v12 }
 0x2c0   :  { %1956 = vmatprep.subr.mxu1 %v2169_v12  ;;  %1926 = vmatpush3.msra.mxu0 %v1387_v55 }
 0x2c1   :  { %1957 = vmatpush3.msra.mxu1 %v1373_v9  ;;  %1927 = vmatprep.subr.mxu0 %v2169_v12 }
 0x2c2   :  { %1958 = vmatprep.subr.mxu1 %v2169_v12  ;;  %1928 = vmatpush3.msra.mxu0 %v1386_v56 }
 0x2c3   :  { %1959 = vmatpush3.msra.mxu1 %v1372_v54  ;;  %1929 = vmatprep.subr.mxu0 %v2169_v12 }
 0x2c4   :  { %1960 = vmatprep.subr.mxu1 %v2169_v12  ;;  %1930 = vmatpush3.msra.mxu0 %v1385_v58 }
 0x2c5   :  { %1961 = vmatpush3.msra.mxu1 %v1371_v15  ;;  %1931 = vmatprep.subr.mxu0 %v2169_v12 }
 0x2c6   :  { %1962 = vmatprep.subr.mxu1 %v2169_v12  ;;  %1932 = vmatpush3.msra.mxu0 %v1384_v60 }
 0x2c7   :  { %1963 = vmatpush3.msra.mxu1 %v1370_v57  ;;  %1933 = vmatprep.subr.mxu0 %v2169_v12 }
 0x2c8   :  { %1964 = vmatprep.subr.mxu1 %v2169_v12  ;;  %1934 = vmatpush3.msra.mxu0 %v1383_v8 }
 0x2c9   :  { %1965 = vmatpush3.msra.mxu1 %v1369_v59  ;;  %1935 = vmatprep.subr.mxu0 %v2169_v12 }
 0x2ca   :  { %1966 = vmatprep.subr.mxu1 %v2169_v12  ;;  %1936 = vmatpush3.msra.mxu0 %v1382_v10 }
 0x2cb   :  { %1967 = vmatpush3.msra.mxu1 %v1368_v62  ;;  %1937 = vmatprep.subr.mxu0 %v2169_v12 }
 0x2cc   :  { %1968 = vmatprep.subr.mxu1 %v2169_v12  ;;  %1938 = vmatpush3.msra.mxu0 %v1381_v13 }
 0x2cd   :  { %1969 = vmatpush3.msra.mxu1 %v1367_v63  ;;  %1940 = vmatmul.mubr.f32.vlgmr.msra.gmra.mxu0 %v2336_v42 }
 0x2ce   :  { %1970 = vmatprep.subr.mxu1 %v2169_v12 }
 0x2cf   :  { %1971 = vmatpush3.msra.mxu1 %v1366_v11 }
 0x2d0   :  { %1972 = vmatprep.subr.mxu1 %v2169_v12 }
 0x2d1   :  { %1973 = vmatpush3.msra.mxu1 %v1365_v61 }
 0x356   :  { %v850_v16 = vpop.f32.mrf.mxu1 }
 0x358   :  { %v1871_v17 = vpop.f32.mrf.mxu1 }
 0x35a   :  { %v923_v18 = vpop.f32.mrf.mxu1 }
 0x35b   :  { %v1475_v25 = vrot.slane %v923_v18, 7 }
 0x35c   :  { %v1876_v0 = vpop.f32.mrf.mxu1 }
 0x35d   :  { %v1477_v28 = vsel %vm1476_vm10, %v1475_v25, %v850_v16 }
 0x35e   :  { %v996_v1 = vpop.f32.mrf.mxu1 }
 0x35f   :  { %v1478_v26 = vrot.slane %v996_v1, 6 }
 0x360   :  { %v1881_v19 = vpop.f32.mrf.mxu1 }
 0x361   :  { %v1480_v30 = vsel %vm1479_vm11, %v1478_v26, %v1477_v28 }
 0x362   :  { %v1069_v20 = vpop.f32.mrf.mxu1 }
 0x363   :  { %v1481_v12 = vrot.slane %v1069_v20, 5 }
 0x364   :  { %v1886_v21 = vpop.f32.mrf.mxu1 }
 0x365   :  { %v1483_v32 = vsel %vm1482_vm12, %v1481_v12, %v1480_v30 }
 0x366   :  { %v1142_v2 = vpop.f32.mrf.mxu1 }
 0x367   :  { %v1484_v27 = vrot.slane %v1142_v2, 4 }
 0x368   :  { %v1891_v22 = vpop.f32.mrf.mxu1 }
 0x369   :  { %v1486_v33 = vsel %vm1485_vm13, %v1484_v27, %v1483_v32 }
 0x36a   :  { %v1215_v24 = vpop.f32.mrf.mxu1 }
 0x36b   :  { %v1487_v29 = vrot.slane %v1215_v24, 3 }
 0x36c   :  { %v1896_v3 = vpop.f32.mrf.mxu1 }
 0x36d   :  { %v1489_v5 = vsel %vm1488_vm14, %v1487_v29, %v1486_v33 }
 0x36e   :  { %v1288_v42 = vpop.f32.mrf.mxu1 }
 0x36f   :  { %v1490_v4 = vrot.slane %v1288_v42, 2 }
 0x370   :  { %v1901_v31 = vpop.f32.mrf.mxu1 }
 0x371   :  { %v1492_v36 = vsel %vm1491_vm15, %v1490_v4, %v1489_v5 }
 0x372   :  { %v1361_v34 = vpop.f32.mrf.mxu1 }
 0x373   :  { %v1493_v35 = vrot.slane %v1361_v34, 1 }
 0x374   :  { %v1906_v37 = vpop.f32.mrf.mxu1 }
 0x375   :  { %v1495_v38 = vsel %vm1494_vm0, %v1493_v35, %v1492_v36 }
 0x376   :  { %1975 = vmatmul.mubr.f32.vlgmr.msra.gmra.mxu1 %v1495_v38 }
 0x38d   :  { %v1463_v6 = vpop.f32.mrf.mxu0 }
 0x38f   :  { %v1941_v23 = vpop.f32.mrf.mxu0 }
 0x436   :  { %v1563_v7 = vpop.f32.mrf.mxu1 }
 0x437   :  { %v1564_v40 = vadd.f32 %v1563_v7, %v1463_v6 }
 0x438   :  { %v1976_v41 = vpop.f32.mrf.mxu1 }
 0x439   :  { %v1574_v43 = vadd.f32 %v1628_v39, %v1564_v40 }
 0x43b   :  { %1575 = vst [vmem:[#allocation13] sm:$0xff] %v1574_v43 }
 0x43c   :  { %2135 = shalt.err (!%p2132_p2)
}
 0x43d   :  { %1585 = dma.vmem_to_hbm [thread:$0]  %s1583_s2, 128, %s2563_s10, [#allocation7]  }
 0x43e   :  { %2156 = dma.done.wait [#allocation7], 128  }
 0x43f   :  { %2157 = vsyncadd [#allocation7], 4294967168 }
 0x440   :  { %1589 = vsyncpa [#allocation6], 1 }
 0x441   :  { %1590 = vsyncpa [#allocation9], 1 }
 0x442   :  { %1591 = vsyncpa [#allocation12], 1 }
 0x443   :  { %1592 = vsyncpa [#allocation7], 1 }

// kernel: tpu_custom_call.1
= control target key start
LH: loop header
LB: loop body
LE: loop exit
PB: predicated region body
PF: predicated region fallthrough
CT: control target
= control target key end

     0   :  { %s2553_s0 = inlined_call_operand.vmem [shape: s32[8], index: 0, kind: input, shape index: {}]   ;;  %s2554_s1 = inlined_call_operand.vmem [shape: s32[8,1], index: 1, kind: input, shape index: {}]   ;;  %s2555_s2 = inlined_call_operand.hbm [shape: f32[64,128], index: 2, kind: input, shape index: {}]   ;;  %s2556_s3 = inlined_call_operand.vmem [shape: f32[128,128], index: 3, kind: input, shape index: {}]   ;;  %s2557_s4 = inlined_call_operand.vmem [shape: f32[1,128], index: 4, kind: input, shape index: {}]   ;;  %s2558_s5 = inlined_call_operand.hbm [shape: f32[128,128], index: 5, kind: input, shape index: {}]   ;;  %s2559_s6 = inlined_call_operand.vmem [shape: f32[128,1], index: 6, kind: input, shape index: {}]   ;;  %s2560_s7 = inlined_call_operand.hbm [shape: f32[128,128], index: 7, kind: input, shape index: {}]   ;;  %s2561_s8 = inlined_call_operand.hbm [shape: f32[128,128], index: 8, kind: input, shape index: {}]   ;;  %s2562_s9 = inlined_call_operand.vmem [shape: f32[1,128], index: 9, kind: input, shape index: {}]   ;;  %s2563_s10 = inlined_call_operand.hbm [shape: f32[8,128], index: 10, kind: output, shape index: {}]  }
   0x1   :  { %s15_s15 = sshll.u32 %s2553_s0, 4  ;;  %s16_s15 = int_to_ptr.vmem [resolvable:$true] %s15_s15 }
   0x2   :  { %s2032_s16 = scalar_lea.vmem %s16_s15, 16  ;;  %p2037_p1 = scmp.lt.s32.totalorder %s16_s15, %s16_s15 }
   0x3   :  { %p2033_p0 = scmp.ne.s32.totalorder %s16_s15, %s2032_s16  ;;  %p2038_p2 = scmp.lt.s32.totalorder %s2032_s16, %s2032_s16 }
   0x5   :  { %p2039_p3 = por %p2038_p2, %p2037_p1 }
   0x7   :  { %p2040_p4 = pnand %p2039_p3, %p2033_p0 }
   0x9   :  { %2043 = shalt.err (!%p2040_p4)  }
   0xa   :  { %s2162_s17 = smov [#allocation4]  }
   0xb   :  { %18 = dma.vmem_to_smem %s16_s15, 16, %s2162_s17, [#allocation3] }
   0xc   :  { %2148 = dma.done.wait [#allocation3], 16 }
   0xd   :  { %2149 = vsyncadd [#allocation3], 4294967280 }
   0xe   :  { %20 = sfence }
   0xf   :  { %21 = vsyncpa [#allocation6], 0 }
  0x10   :  { %22 = vsyncpa [#allocation9], 0 }
  0x11   :  { %23 = vsyncpa [#allocation12], 0 }
  0x12   :  { %24 = vsyncpa [#allocation7], 0  ;;  %s2163_s18 = smov [#allocation8]   ;;  %s2164_s0 = smov [#allocation5]  }
  0x13   :  { %s48_s19 = sshll.u32 %s2163_s18, 4  ;;  %s32_s20 = sshll.u32 %s2164_s0, 4  ;;  %s49_s19 = int_to_ptr.vmem [resolvable:$true] %s48_s19  ;;  %s33_s20 = int_to_ptr.vmem [resolvable:$true] %s32_s20 }
  0x14   :  { %s2052_s21 = scalar_lea.vmem %s49_s19, 2048  ;;  %p2057_p6 = scmp.lt.s32.totalorder %s49_s19, %s49_s19 }
  0x15   :  { %p2053_p5 = scmp.ne.s32.totalorder %s49_s19, %s2052_s21  ;;  %p2058_p7 = scmp.lt.s32.totalorder %s2052_s21, %s2052_s21 }
  0x17   :  { %p2059_p8 = por %p2058_p7, %p2057_p6 }
  0x19   :  { %p2060_p9 = pnand %p2059_p8, %p2053_p5 }
  0x1b   :  { %2063 = shalt.err (!%p2060_p9)
}
  0x1c   :  { %s2165_s22 = smov 128   ;;  %s2166_s23 = smov 8  }
  0x1d   :  { %54 = dma.hbm_to_vmem [thread:$0]  %s2558_s5, 2048, %s49_s19, [#allocation9], %s2165_s22, %s2165_s22, %s2166_s23  }
  0x1e   :  { %s2072_s26 = scalar_lea.vmem %s33_s20, 1024  ;;  %p2077_p11 = scmp.lt.s32.totalorder %s33_s20, %s33_s20 }
  0x1f   :  { %p2073_p10 = scmp.ne.s32.totalorder %s33_s20, %s2072_s26  ;;  %p2078_p12 = scmp.lt.s32.totalorder %s2072_s26, %s2072_s26 }
  0x21   :  { %p2079_p13 = por %p2078_p12, %p2077_p11 }
  0x23   :  { %p2080_p0 = pnand %p2079_p13, %p2073_p10 }
  0x25   :  { %2083 = shalt.err (!%p2080_p0)
}
  0x26   :  { %38 = dma.hbm_to_vmem [thread:$0]  %s2555_s2, 1024, %s33_s20, [#allocation6], %s2165_s22, %s2165_s22, %s2166_s23  }
  0x27   :  { %s2167_s29 = smov [#allocation10]   ;;  %s2168_s11 = smov [#allocation11]  }
  0x28   :  { %s62_s30 = sshll.u32 %s2167_s29, 4  ;;  %s74_s12 = sshll.u32 %s2168_s11, 4  ;;  %s63_s30 = int_to_ptr.vmem [resolvable:$true] %s62_s30  ;;  %s75_s12 = int_to_ptr.vmem [resolvable:$true] %s74_s12 }
  0x29   :  { %s2092_s5 = scalar_lea.vmem %s63_s30, 2048  ;;  %p2097_p2 = scmp.lt.s32.totalorder %s63_s30, %s63_s30 }
  0x2a   :  { %p2093_p1 = scmp.ne.s32.totalorder %s63_s30, %s2092_s5  ;;  %p2098_p3 = scmp.lt.s32.totalorder %s2092_s5, %s2092_s5 }
  0x2c   :  { %p2099_p4 = por %p2098_p3, %p2097_p2 }
  0x2e   :  { %p2100_p5 = pnand %p2099_p4, %p2093_p1 }
  0x30   :  { %2103 = shalt.err (!%p2100_p5)
}
  0x31   :  { %68 = dma.hbm_to_vmem [thread:$0]  %s2560_s7, 2048, %s63_s30, [#allocation9], %s2165_s22, %s2165_s22, %s2166_s23  }
  0x32   :  { %s2112_s2 = scalar_lea.vmem %s75_s12, 2048  ;;  %p2117_p7 = scmp.lt.s32.totalorder %s75_s12, %s75_s12 }
  0x33   :  { %p2113_p6 = scmp.ne.s32.totalorder %s75_s12, %s2112_s2  ;;  %p2118_p8 = scmp.lt.s32.totalorder %s2112_s2, %s2112_s2 }
  0x35   :  { %p2119_p9 = por %p2118_p8, %p2117_p7 }
  0x37   :  { %p2120_p10 = pnand %p2119_p9, %p2113_p6 }
  0x39   :  { %2123 = shalt.err (!%p2120_p10)
}
  0x3a   :  { %80 = dma.hbm_to_vmem [thread:$0]  %s2561_s8, 2048, %s75_s12, [#allocation12], %s2165_s22, %s2165_s22, %s2166_s23  }
  0x3b   :  { %2150 = dma.done.wait [#allocation6], 1024  }
  0x3c   :  { %2151 = vsyncadd [#allocation6], 4294966272 }
  0x3d   :  { %2152 = dma.done.wait [#allocation9], 4096  }
  0x3e   :  { %2153 = vsyncadd [#allocation9], 4294963200 }
  0x3f   :  { %2154 = dma.done.wait [#allocation12], 2048  }
  0x40   :  { %2155 = vsyncadd [#allocation12], 4294965248  ;;  %v2256_v0 = vld [vmem:[#allocation5] sm:$0xff]  ;;  %v2258_v1 = vld [vmem:[#allocation5 + $0x8] sm:$0xff]  ;;  %s2158_s7 = smov 0  }
  0x41   :  { %v2260_v2 = vld [vmem:[#allocation5 + $0x10] sm:$0xff]  ;;  %v2262_v3 = vld [vmem:[#allocation5 + $0x18] sm:$0xff]  ;;  %v2264_v4 = vld [vmem:[#allocation5 + $0x20] sm:$0xff] }
  0x42   :  { %v2266_v5 = vld [vmem:[#allocation5 + $0x28] sm:$0xff]  ;;  %v2268_v6 = vld [vmem:[#allocation5 + $0x30] sm:$0xff]  ;;  %v2270_v7 = vld [vmem:[#allocation5 + $0x38] sm:$0xff] }
  0x43 LB: > { %s111_s8 = sld [smem:[#allocation4 + %s2160_s7]]  ;;  %s1602_s17 = sshll.u32 %s2160_s7, 3  ;;  %s2160_s7 = sphi %s2158_s7, %s109_s7  }
  0x44   : > { %s116_s0 = scalar_lea.vmem [#allocation2], %s2160_s7  ;;  %s109_s7 = sadd.s32 1, %s2160_s7  }
  0x45   : > { %p106_p11 = scmp.ge.s32.totalorder %s109_s7, 8  }
  0x46   :  { %v227_v9 = vld [vmem:[#allocation8 + $0x78] sm:$0xff] (%p106_p11)  ;;  %v134_v10 = vld [vmem:[%s2556_s3 + $0x78] sm:$0xff] (%p106_p11)  ;;  %1811 = vmatprep.mubr.f32.mxu1 (%p106_p11), %v2256_v0  ;;  %v2169_v12 = vmov (%p106_p11), 0.0   ;;  %v133_v13 = vld [vmem:[%s2556_s3 + $0x70] sm:$0xff] (%p106_p11)  ;;  %vm2170_vm0 = vmmov (%p106_p11), 0   ;;  %v338_v61 = vlaneseq (%p106_p11)  ;;  %vm780_vm2 = vcmask (%p106_p11), 64512  }
  0x47   :  { %v226_v11 = vld [vmem:[#allocation8 + $0x70] sm:$0xff] (%p106_p11)  ;;  %1744 = vmatprep.subr.mxu0 (%p106_p11), %v2169_v12  ;;  %1779 = vmatprep.subr.mxu1 (%p106_p11), %v227_v9  ;;  %v225_v14 = vld [vmem:[#allocation8 + $0x68] sm:$0xff] (%p106_p11)  ;;  %v132_v15 = vld [vmem:[%s2556_s3 + $0x68] sm:$0xff] (%p106_p11)  ;;  %v2171_v59 = vmov (%p106_p11), 1966171168   ;;  %vm1476_vm10 = vcmask (%p106_p11), 1041409  }
  0x48   :  { %108 = sbr.rel (!%p106_p11) target bundleno = 67 (0x43), region = 81  ;;  %1745 = vmatpush3.msra.mxu0 (%p106_p11), %v134_v10  ;;  %1780 = vmatpush3.msra.mxu1 (%p106_p11), %v227_v9  ;;  %v224_v16 = vld [vmem:[#allocation8 + $0x60] sm:$0xff] (%p106_p11)  ;;  %v131_v17 = vld [vmem:[%s2556_s3 + $0x60] sm:$0xff] (%p106_p11)  ;;  %v130_v19 = vld [vmem:[%s2556_s3 + $0x58] sm:$0xff] (%p106_p11)  ;;  %v336_v60 = vunpack.c.l.s4 (%p106_p11), %v2171_v59  ;;  %v339_v63 = vshrl.u32 (%p106_p11), %v338_v61, 7  ;;  %v2172_v10 = vmov (%p106_p11), 0  }
  0x49   : > { %s113_s18 = sadd.s32 %s1602_s17, %s111_s8  ;;  %1746 = vmatprep.subr.mxu0 (%p106_p11), %v2169_v12  ;;  %1781 = vmatprep.subr.mxu1 (%p106_p11), %v226_v11  ;;  %v223_v18 = vld [vmem:[#allocation8 + $0x58] sm:$0xff] (%p106_p11)  ;;  %v222_v20 = vld [vmem:[#allocation8 + $0x50] sm:$0xff] (%p106_p11)  ;;  %v129_v21 = vld [vmem:[%s2556_s3 + $0x50] sm:$0xff] (%p106_p11)  ;;  %vm1479_vm11 = vcmask (%p106_p11), 1042434   ;;  %vm1482_vm12 = vcmask (%p106_p11), 1043459   ;;  %vm1485_vm13 = vcmask (%p106_p11), 1044484  }
  0x4a   : > { %s114_s19 = scalar_lea.vmem [#allocation5], %s113_s18  ;;  %1747 = vmatpush3.msra.mxu0 (%p106_p11), %v133_v13  ;;  %1782 = vmatpush3.msra.mxu1 (%p106_p11), %v226_v11  ;;  %v221_v22 = vld [vmem:[#allocation8 + $0x48] sm:$0xff] (%p106_p11)  ;;  %v128_v23 = vld [vmem:[%s2556_s3 + $0x48] sm:$0xff] (%p106_p11)  ;;  %v127_v25 = vld [vmem:[%s2556_s3 + $0x40] sm:$0xff] (%p106_p11)  ;;  %v337_v62 = vunpack.c.0.s8 (%p106_p11), %v336_v60  ;;  %vm1488_vm14 = vcmask (%p106_p11), 1045509   ;;  %vm1491_vm15 = vcmask (%p106_p11), 1046534  }
  0x4b   : > { %v115_v8 = vld [vmem:[%s114_s19] sm:$0x1]  ;;  %1748 = vmatprep.subr.mxu0 (%p106_p11), %v2169_v12  ;;  %1783 = vmatprep.subr.mxu1 (%p106_p11), %v225_v14  ;;  %v220_v24 = vld [vmem:[#allocation8 + $0x40] sm:$0xff] (%p106_p11)  ;;  %v126_v27 = vld [vmem:[%s2556_s3 + $0x38] sm:$0xff] (%p106_p11)  ;;  %s2173_s14 = smov (%p106_p11), [#allocation13]  }
  0x4c   : > { %117 = vst [vmem:[%s116_s0] sm:$0x1] %v115_v8  ;;  %1749 = vmatpush3.msra.mxu0 (%p106_p11), %v132_v15  ;;  %1784 = vmatpush3.msra.mxu1 (%p106_p11), %v225_v14  ;;  %v219_v26 = vld [vmem:[#allocation8 + $0x38] sm:$0xff] (%p106_p11)  ;;  %v218_v28 = vld [vmem:[#allocation8 + $0x30] sm:$0xff] (%p106_p11)  ;;  %v125_v29 = vld [vmem:[%s2556_s3 + $0x30] sm:$0xff] (%p106_p11)  ;;  %v2402_v8 = vsub.s32 (%p106_p11), %v337_v62, %v339_v63  ;;  %s1582_s2 = sshll.u32 (%p106_p11), %s2173_s14, 4  ;;  %s1583_s2 = int_to_ptr.vmem [resolvable:$true] %s1582_s2 }
  0x4d   :  { %1750 = vmatprep.subr.mxu0 %v2169_v12  ;;  %1785 = vmatprep.subr.mxu1 %v224_v16  ;;  %v217_v30 = vld [vmem:[#allocation8 + $0x28] sm:$0xff]  ;;  %v124_v31 = vld [vmem:[%s2556_s3 + $0x28] sm:$0xff]  ;;  %v123_v33 = vld [vmem:[%s2556_s3 + $0x20] sm:$0xff]  ;;  %s2124_s15 = scalar_lea.vmem %s1583_s2, 128  ;;  %p2129_p13 = scmp.lt.s32.totalorder %s1583_s2, %s1583_s2 }
  0x4e   :  { %1751 = vmatpush3.msra.mxu0 %v131_v17  ;;  %1786 = vmatpush3.msra.mxu1 %v224_v16  ;;  %v216_v32 = vld [vmem:[#allocation8 + $0x20] sm:$0xff]  ;;  %v215_v34 = vld [vmem:[#allocation8 + $0x18] sm:$0xff]  ;;  %v122_v35 = vld [vmem:[%s2556_s3 + $0x18] sm:$0xff]  ;;  %p2125_p12 = scmp.ne.s32.totalorder %s1583_s2, %s2124_s15  ;;  %p2130_p0 = scmp.lt.s32.totalorder %s2124_s15, %s2124_s15 }
  0x4f   :  { %1752 = vmatprep.subr.mxu0 %v2169_v12  ;;  %1787 = vmatprep.subr.mxu1 %v223_v18  ;;  %v214_v36 = vld [vmem:[#allocation8 + $0x10] sm:$0xff]  ;;  %v121_v37 = vld [vmem:[%s2556_s3 + $0x10] sm:$0xff]  ;;  %v120_v39 = vld [vmem:[%s2556_s3 + $0x8] sm:$0xff] }
  0x50   :  { %1753 = vmatpush3.msra.mxu0 %v130_v19  ;;  %1788 = vmatpush3.msra.mxu1 %v223_v18  ;;  %v213_v38 = vld [vmem:[#allocation8 + $0x8] sm:$0xff]  ;;  %v212_v40 = vld [vmem:[#allocation8] sm:$0xff]  ;;  %v119_v41 = vld [vmem:[%s2556_s3] sm:$0xff]  ;;  %p2131_p1 = por %p2130_p0, %p2129_p13 }
  0x51   :  { %1754 = vmatprep.subr.mxu0 %v2169_v12  ;;  %1789 = vmatprep.subr.mxu1 %v222_v20  ;;  %v494_v43 = vld [vmem:[%s2559_s6 + $0x78] sm:$0xff]  ;;  %v493_v44 = vld [vmem:[%s2559_s6 + $0x70] sm:$0xff]  ;;  %v492_v45 = vld [vmem:[%s2559_s6 + $0x68] sm:$0xff] }
  0x52   :  { %1755 = vmatpush3.msra.mxu0 %v129_v21  ;;  %1790 = vmatpush3.msra.mxu1 %v222_v20  ;;  %v491_v46 = vld [vmem:[%s2559_s6 + $0x60] sm:$0xff]  ;;  %v490_v47 = vld [vmem:[%s2559_s6 + $0x58] sm:$0xff]  ;;  %v489_v48 = vld [vmem:[%s2559_s6 + $0x50] sm:$0xff]  ;;  %p2132_p2 = pnand %p2131_p1, %p2125_p12 }
  0x53   :  { %1756 = vmatprep.subr.mxu0 %v2169_v12  ;;  %1791 = vmatprep.subr.mxu1 %v221_v22  ;;  %v2336_v42 = vld [vmem:[#allocation2] sm:$0xff]  ;;  %v488_v49 = vld [vmem:[%s2559_s6 + $0x48] sm:$0xff]  ;;  %v486_v51 = vld [vmem:[%s2559_s6 + $0x38] sm:$0xff] }
  0x54   :  { %1757 = vmatpush3.msra.mxu0 %v128_v23  ;;  %1792 = vmatpush3.msra.mxu1 %v221_v22  ;;  %v487_v50 = vld [vmem:[%s2559_s6 + $0x40] sm:$0xff]  ;;  %v485_v52 = vld [vmem:[%s2559_s6 + $0x30] sm:$0xff]  ;;  %v484_v53 = vld [vmem:[%s2559_s6 + $0x28] sm:$0xff]  ;;  %v2423_v23 = vsub.s32 0, %v339_v63 }
  0x55   :  { %1758 = vmatprep.subr.mxu0 %v2169_v12  ;;  %1793 = vmatprep.subr.mxu1 %v220_v24  ;;  %v483_v54 = vld [vmem:[%s2559_s6 + $0x20] sm:$0xff]  ;;  %v482_v55 = vld [vmem:[%s2559_s6 + $0x18] sm:$0xff]  ;;  %v481_v56 = vld [vmem:[%s2559_s6 + $0x10] sm:$0xff] }
  0x56   :  { %1759 = vmatpush3.msra.mxu0 %v127_v25  ;;  %1794 = vmatpush3.msra.mxu1 %v220_v24  ;;  %v480_v57 = vld [vmem:[%s2559_s6 + $0x8] sm:$0xff]  ;;  %v479_v58 = vld [vmem:[%s2559_s6] sm:$0xff] }
  0x57   :  { %1760 = vmatprep.subr.mxu0 %v2169_v12  ;;  %1795 = vmatprep.subr.mxu1 %v219_v26  ;;  %v2407_v9 = vld [vmem:[%s2554_s1] sm:$0xff] }
  0x58   :  { %1761 = vmatpush3.msra.mxu0 %v126_v27  ;;  %1796 = vmatpush3.msra.mxu1 %v219_v26  ;;  %v658_v11 = vrot.slane %v2407_v9, %v2402_v8  ;;  %v1603_v16 = vld [vmem:[%s2557_s4] ss:$0 sm:$0xff] }
  0x59   :  { %1762 = vmatprep.subr.mxu0 %v2169_v12  ;;  %1797 = vmatprep.subr.mxu1 %v218_v28 }
  0x5a   :  { %1763 = vmatpush3.msra.mxu0 %v125_v29  ;;  %1798 = vmatpush3.msra.mxu1 %v218_v28  ;;  %v666_v13 = vcombine.high %v658_v11, %v658_v11  ;;  %v2412_v14 = vrot.slane %v658_v11, %v2402_v8 }
  0x5b   :  { %1764 = vmatprep.subr.mxu0 %v2169_v12  ;;  %1799 = vmatprep.subr.mxu1 %v217_v30 }
  0x5c   :  { %1765 = vmatpush3.msra.mxu0 %v124_v31  ;;  %1800 = vmatpush3.msra.mxu1 %v217_v30  ;;  %v2415_v15 = vrot.slane %v666_v13, %v2402_v8 }
  0x5d   :  { %1766 = vmatprep.subr.mxu0 %v2169_v12  ;;  %1801 = vmatprep.subr.mxu1 %v216_v32 }
  0x5e   :  { %1767 = vmatpush3.msra.mxu0 %v123_v33  ;;  %1802 = vmatpush3.msra.mxu1 %v216_v32 }
  0x5f   :  { %1768 = vmatprep.subr.mxu0 %v2169_v12  ;;  %1803 = vmatprep.subr.mxu1 %v215_v34 }
  0x60   :  { %1769 = vmatpush3.msra.mxu0 %v122_v35  ;;  %1804 = vmatpush3.msra.mxu1 %v215_v34 }
  0x61   :  { %1770 = vmatprep.subr.mxu0 %v2169_v12  ;;  %1805 = vmatprep.subr.mxu1 %v214_v36 }
  0x62   :  { %1771 = vmatpush3.msra.mxu0 %v121_v37  ;;  %1806 = vmatpush3.msra.mxu1 %v214_v36 }
  0x63   :  { %1772 = vmatprep.subr.mxu0 %v2169_v12  ;;  %1807 = vmatprep.subr.mxu1 %v213_v38 }
  0x64   :  { %1773 = vmatpush3.msra.mxu0 %v120_v39  ;;  %1808 = vmatpush3.msra.mxu1 %v213_v38 }
  0x65   :  { %1774 = vmatprep.subr.mxu0 %v2169_v12  ;;  %1809 = vmatprep.subr.mxu1 %v212_v40 }
  0x66   :  { %1775 = vmatpush3.msra.mxu0 %v119_v41  ;;  %1776 = vmatprep.mubr.msk.f32.mxu0 %vm2170_vm0, %v2169_v12 }
  0x67   :  { %1810 = vmatpush3.msra.mxu1 %v212_v40  ;;  %1777 = vmatmul.mubr.f32.vlgmr.msra.gmra.mxu0 %v2336_v42 }
  0x68   :  { %1812 = vmatmul.mubr.f32.vlgmr.msra.gmra.mxu1 %v2258_v1  ;;  %1867 = vmatprep.subr.mxu1 %v2169_v12 }
  0x69   :  { %1814 = vmatprep.mubr.f32.mxu1 %v2260_v2  ;;  %1823 = vmatprep.subr.mxu0 %v494_v43 }
  0x6a   :  { %1824 = vmatpush3.msra.mxu0 %v494_v43  ;;  %1998 = vset.pattern.permute.xlu1 %v2172_v10 }
  0x6b   :  { %1825 = vmatprep.subr.mxu0 %v493_v44  ;;  %1997 = vset.pattern.permute.xlu0 %v2172_v10 }
  0x6c   :  { %1815 = vmatmul.mubr.f32.gmra.mxu1 %v2262_v3  ;;  %1826 = vmatpush3.msra.mxu0 %v493_v44 }
  0x6d   :  { %1817 = vmatprep.mubr.f32.mxu1 %v2264_v4  ;;  %1827 = vmatprep.subr.mxu0 %v492_v45 }
  0x6e   :  { %1828 = vmatpush3.msra.mxu0 %v492_v45  ;;  %701 = vperm.xlu0 %1997, %v2412_v14  }
  0x6f   :  { %1829 = vmatprep.subr.mxu0 %v491_v46  ;;  %708 = vperm.xlu1 %1998, %v2415_v15  }
  0x70   :  { %1818 = vmatmul.mubr.f32.gmra.mxu1 %v2266_v5  ;;  %1830 = vmatpush3.msra.mxu0 %v491_v46 }
  0x71   :  { %1820 = vmatprep.mubr.f32.mxu1 %v2268_v6  ;;  %1831 = vmatprep.subr.mxu0 %v490_v47 }
  0x72   :  { %1832 = vmatpush3.msra.mxu0 %v490_v47 }
  0x73   :  { %1833 = vmatprep.subr.mxu0 %v489_v48 }
  0x74   :  { %1821 = vmatmul.mubr.f32.gmra.mxu1 %v2270_v7  ;;  %1834 = vmatpush3.msra.mxu0 %v489_v48 }
  0x75   :  { %1869 = vmatprep.mubr.msk.f32.mxu1 %vm2170_vm0, %v2169_v12  ;;  %1835 = vmatprep.subr.mxu0 %v488_v49 }
  0x76   :  { %1836 = vmatpush3.msra.mxu0 %v488_v49 }
  0x77   :  { %1837 = vmatprep.subr.mxu0 %v487_v50 }
  0x78   :  { %1838 = vmatpush3.msra.mxu0 %v487_v50 }
  0x79   :  { %1839 = vmatprep.subr.mxu0 %v486_v51 }
  0x7a   :  { %1840 = vmatpush3.msra.mxu0 %v486_v51 }
  0x7b   :  { %1841 = vmatprep.subr.mxu0 %v485_v52 }
  0x7c   :  { %1842 = vmatpush3.msra.mxu0 %v485_v52 }
  0x7d   :  { %1843 = vmatprep.subr.mxu0 %v484_v53 }
  0x7e   :  { %1844 = vmatpush3.msra.mxu0 %v484_v53 }
  0x7f   :  { %1845 = vmatprep.subr.mxu0 %v483_v54 }
  0x80   :  { %1846 = vmatpush3.msra.mxu0 %v483_v54 }
  0x81   :  { %1847 = vmatprep.subr.mxu0 %v482_v55 }
  0x82   :  { %1848 = vmatpush3.msra.mxu0 %v482_v55 }
  0x83   :  { %1849 = vmatprep.subr.mxu0 %v481_v56 }
  0x84   :  { %1850 = vmatpush3.msra.mxu0 %v481_v56 }
  0x85   :  { %1851 = vmatprep.subr.mxu0 %v480_v57 }
  0x86   :  { %1852 = vmatpush3.msra.mxu0 %v480_v57 }
  0x87   :  { %1853 = vmatprep.subr.mxu0 %v479_v58 }
  0x88   :  { %1854 = vmatpush3.msra.mxu0 %v479_v58 }
  0x89   :  { %1907 = vmatprep.subr.mxu0 %v2169_v12 }
 0x127   :  { %v208_v17 = vpop.f32.mrf.mxu0 }
 0x128   :  { %v209_v18 = vadd.f32 %v1603_v16, %v208_v17  ;;  %v1813_v19 = vpop.f32.mrf.mxu1 }
 0x129   :  { %v1778_v20 = vpop.f32.mrf.mxu0 }
 0x12a   :  { %v334_v21 = vcombine.high %v209_v18, %v209_v18  ;;  %v341_v22 = vrot.slane %v209_v18, %v2402_v8  ;;  %v294_v24 = vpop.f32.mrf.mxu1 }
 0x12c   :  { %v348_v25 = vrot.slane %v334_v21, %v2402_v8  ;;  %v349_v26 = vcombine.high %v341_v22, %v341_v22  ;;  %v357_v27 = vrot.slane %v341_v22, %v2402_v8  ;;  %v1816_v28 = vpop.f32.mrf.mxu1 }
 0x12e   :  { %v371_v29 = vrot.slane %v349_v26, %v2402_v8  ;;  %v386_v30 = vrot.slane %v357_v27, %v2423_v23  ;;  %v304_v31 = vpop.f32.mrf.mxu1  ;;  %v379_v32 = vcombine.high %v357_v27, %v357_v27  ;;  %v350_v33 = vcombine.high %v348_v25, %v348_v25 }
 0x12f   :  { %v364_v34 = vrot.slane %v348_v25, %v2402_v8 }
 0x130   :  { %v390_v35 = vrot.slane %v371_v29, %v2423_v23  ;;  %v423_v36 = vadd.f32 %v386_v30, %v294_v24  ;;  %v381_v37 = vcombine.high %v371_v29, %v371_v29  ;;  %v394_v38 = vrot.slane %v379_v32, %v2423_v23  ;;  %v1819_v39 = vpop.f32.mrf.mxu1 }
 0x131   :  { %v378_v40 = vrot.slane %v350_v33, %v2402_v8  ;;  %v402_v41 = vrot.slane %v364_v34, %v2423_v23  ;;  %v380_v43 = vcombine.high %v364_v34, %v364_v34 }
 0x132   :  { %v424_v44 = vadd.f32 %v1813_v19, %v390_v35  ;;  %v1604_v45 = vmul.f32 -1.442695, %v423_v36  ;;  %v398_v46 = vrot.slane %v381_v37, %v2423_v23  ;;  %v425_v47 = vadd.f32 %v394_v38, %v304_v31  ;;  %v314_v48 = vpop.f32.mrf.mxu1 }
 0x133   :  { %v406_v49 = vrot.slane %v378_v40, %v2423_v23  ;;  %v427_v50 = vadd.f32 %v402_v41, %v314_v48  ;;  %v382_v51 = vcombine.high %v378_v40, %v378_v40  ;;  %v410_v58 = vrot.slane %v380_v43, %v2423_v23 }
 0x134   :  { %v1605_v52 = vmul.f32 -1.442695, %v424_v44  ;;  %2000 = vpow2.f32 %v1604_v45  ;;  %v426_v53 = vadd.f32 %v1816_v28, %v398_v46  ;;  %v1606_v54 = vmul.f32 -1.442695, %v425_v47  ;;  %v1822_v55 = vpop.f32.mrf.mxu1 }
 0x135   :  { %v428_v56 = vadd.f32 %v1819_v39, %v406_v49  ;;  %v414_v57 = vrot.slane %v382_v51, %v2423_v23  ;;  %v1608_v60 = vmul.f32 -1.442695, %v427_v50  ;;  %v651_v45 = vcombine.high %v2407_v9, %v2407_v9 }
 0x136   :  { %2002 = vpow2.f32 %v1605_v52  ;;  %v1607_v59 = vmul.f32 -1.442695, %v426_v53  ;;  %v324_v62 = vpop.f32.mrf.mxu1  ;;  %v696_v46 = vcombine.high %v2412_v14, %v2412_v14  ;;  %v698_v49 = vcombine.high %v2415_v15, %v2415_v15 }
 0x137   :  { %2004 = vpow2.f32 %v1606_v54  ;;  %v1609_v63 = vmul.f32 -1.442695, %v428_v56  ;;  %v430_v10 = vadd.f32 %v1822_v55, %v414_v57  ;;  %v429_v11 = vadd.f32 %v410_v58, %v324_v62  ;;  %v702_v57 = vpop.permute.xlu0 %701  ;;  %v709_v58 = vpop.permute.xlu1 %708 }
 0x138   :  { %2006 = vpow2.f32 %v1607_v59  ;;  %v665_v50 = vrot.slane %v651_v45, %v2402_v8  ;;  %v2450_v59 = vand.u32 127, %v338_v61  ;;  %v713_v62 = vrot.slane %v709_v58, %v2423_v23  ;;  %v1393_v45 = vld [vmem:[#allocation11 + $0x60] sm:$0xff] }
 0x139   :  { %2008 = vpow2.f32 %v1609_v63  ;;  %v1610_v13 = vmul.f32 -1.442695, %v429_v11  ;;  %v1611_v16 = vmul.f32 -1.442695, %v430_v10  ;;  %v1385_v58 = vld [vmem:[#allocation11 + $0x20] sm:$0xff] }
 0x13a   :  { %2010 = vpow2.f32 %v1608_v60  ;;  %v681_v52 = vrot.slane %v665_v50, %v2402_v8  ;;  %v667_v53 = vcombine.high %v665_v50, %v665_v50  ;;  %v706_v60 = vrot.slane %v702_v57, %v2423_v23  ;;  %v1375_v50 = vld [vmem:[#allocation10 + $0x50] sm:$0xff]  ;;  %v1370_v57 = vld [vmem:[#allocation10 + $0x28] sm:$0xff] }
 0x13b   :  { %2012 = vpow2.f32 %v1610_v13  ;;  %vm757_vm3 = vcmp.lt.s32.totalorder %v2450_v59, %v713_v62  ;;  %v1368_v62 = vld [vmem:[#allocation10 + $0x18] sm:$0xff] }
 0x13c   :  { %2014 = vpow2.f32 %v1611_v16  ;;  %v695_v14 = vrot.slane %v667_v53, %v2402_v8  ;;  %v697_v55 = vcombine.high %v681_v52, %v681_v52  ;;  %vm756_vm1 = vcmp.lt.s32.totalorder %v2450_v59, %v706_v60  ;;  %v1389_v53 = vld [vmem:[#allocation11 + $0x40] sm:$0xff]  ;;  %v1384_v60 = vld [vmem:[#allocation11 + $0x18] sm:$0xff] }
 0x13d   :  { %v1612_v11 = vsel %vm756_vm1, 1.0, %v2169_v12 }
 0x13e   :  { %v699_v56 = vcombine.high %v695_v14, %v695_v14 }
 0x141   :  { %v2001_v17 = vpop.eup %2000 }
 0x142   :  { %v455_v18 = vadd.f32 1.0, %v2001_v17 }
 0x143   :  { %v2003_v19 = vpop.eup %2002 }
 0x144   :  { %v2005_v20 = vpop.eup %2004  ;;  %v456_v21 = vadd.f32 1.0, %v2003_v19  ;;  %2016 = vrcp.f32 %v455_v18 }
 0x145   :  { %v2007_v22 = vpop.eup %2006  ;;  %v457_v24 = vadd.f32 1.0, %v2005_v20 }
 0x146   :  { %v2009_v25 = vpop.eup %2008  ;;  %2018 = vrcp.f32 %v456_v21  ;;  %v458_v26 = vadd.f32 1.0, %v2007_v22 }
 0x147   :  { %v2011_v27 = vpop.eup %2010  ;;  %2020 = vrcp.f32 %v457_v24  ;;  %v460_v30 = vadd.f32 1.0, %v2009_v25 }
 0x148   :  { %v459_v28 = vadd.f32 1.0, %v2011_v27  ;;  %v2013_v29 = vpop.eup %2012  ;;  %2022 = vrcp.f32 %v458_v26 }
 0x149   :  { %v2015_v31 = vpop.eup %2014  ;;  %v461_v32 = vadd.f32 1.0, %v2013_v29 }
 0x14a   :  { %2024 = vrcp.f32 %v459_v28  ;;  %v462_v33 = vadd.f32 1.0, %v2015_v31 }
 0x14b   :  { %2026 = vrcp.f32 %v460_v30 }
 0x14c   :  { %2028 = vrcp.f32 %v461_v32 }
 0x14d   :  { %2030 = vrcp.f32 %v462_v33 }
 0x151   :  { %v2017_v34 = vpop.eup %2016 }
 0x152   :  { %1855 = vmatprep.mubr.f32.mxu0 %v2017_v34 }
 0x153   :  { %v2019_v35 = vpop.eup %2018 }
 0x154   :  { %v2021_v36 = vpop.eup %2020  ;;  %1856 = vmatmul.mubr.f32.vlgmr.msra.gmra.mxu0 %v2019_v35 }
 0x155   :  { %1858 = vmatprep.mubr.f32.mxu0 %v2021_v36  ;;  %v2023_v37 = vpop.eup %2022 }
 0x157   :  { %v2025_v38 = vpop.eup %2024 }
 0x158   :  { %1859 = vmatmul.mubr.f32.gmra.mxu0 %v2023_v37  ;;  %v2027_v39 = vpop.eup %2026 }
 0x159   :  { %1861 = vmatprep.mubr.f32.mxu0 %v2025_v38  ;;  %v2029_v40 = vpop.eup %2028 }
 0x15a   :  { %v2031_v41 = vpop.eup %2030 }
 0x15c   :  { %1862 = vmatmul.mubr.f32.gmra.mxu0 %v2027_v39  ;;  %v1380_v39 = vld [vmem:[#allocation10 + $0x78] sm:$0xff] }
 0x15d   :  { %1864 = vmatprep.mubr.f32.mxu0 %v2029_v40  ;;  %v1395_v40 = vld [vmem:[#allocation11 + $0x70] sm:$0xff] }
 0x160   :  { %1865 = vmatmul.mubr.f32.gmra.mxu0 %v2031_v41  ;;  %v1379_v41 = vld [vmem:[#allocation10 + $0x70] sm:$0xff] }
 0x161   :  { %1939 = vmatprep.mubr.msk.f32.mxu0 %vm2170_vm0, %v2169_v12 }
 0x214   :  { %v1857_v43 = vpop.f32.mrf.mxu0 }
 0x215   :  { %607 = vperm.xlu1 %1998, %v1857_v43   ;;  %v1394_v43 = vld [vmem:[#allocation11 + $0x68] sm:$0xff] }
 0x216   :  { %v561_v44 = vpop.f32.mrf.mxu0 }
 0x217   :  { %602 = vperm.xlu0 %1997, %v561_v44   ;;  %v1378_v44 = vld [vmem:[#allocation10 + $0x68] sm:$0xff] }
 0x218   :  { %v1860_v47 = vpop.f32.mrf.mxu0 }
 0x21a   :  { %v571_v48 = vpop.f32.mrf.mxu0 }
 0x21b   :  { %715 = vperm.xlu0 %1997, %v696_v46   ;;  %612 = vperm.xlu1 %1998, %v571_v48   ;;  %v1377_v46 = vld [vmem:[#allocation10 + $0x60] sm:$0xff]  ;;  %v1376_v48 = vld [vmem:[#allocation10 + $0x58] sm:$0xff] }
 0x21c   :  { %v1863_v51 = vpop.f32.mrf.mxu0 }
 0x21e   :  { %v581_v9 = vpop.f32.mrf.mxu0 }
 0x21f   :  { %722 = vperm.xlu0 %1997, %v698_v49   ;;  %617 = vperm.xlu1 %1998, %v1860_v47   ;;  %v1392_v47 = vld [vmem:[#allocation11 + $0x58] sm:$0xff]  ;;  %v1391_v49 = vld [vmem:[#allocation11 + $0x50] sm:$0xff] }
 0x220   :  { %v1866_v54 = vpop.f32.mrf.mxu0 }
 0x222   :  { %v591_v15 = vpop.f32.mrf.mxu0 }
 0x223   :  { %729 = vperm.xlu0 %1997, %v681_v52   ;;  %622 = vperm.xlu1 %1998, %v581_v9   ;;  %v1374_v52 = vld [vmem:[#allocation10 + $0x48] sm:$0xff]  ;;  %v1373_v9 = vld [vmem:[#allocation10 + $0x40] sm:$0xff] }
 0x227   :  { %736 = vperm.xlu0 %1997, %v695_v14   ;;  %627 = vperm.xlu1 %1998, %v1863_v51   ;;  %v1390_v51 = vld [vmem:[#allocation11 + $0x48] sm:$0xff]  ;;  %v1388_v14 = vld [vmem:[#allocation11 + $0x38] sm:$0xff] }
 0x22b   :  { %743 = vperm.xlu0 %1997, %v697_v55   ;;  %632 = vperm.xlu1 %1998, %v591_v15   ;;  %v1387_v55 = vld [vmem:[#allocation11 + $0x30] sm:$0xff] }
 0x22c   :  { %v1371_v15 = vld [vmem:[#allocation10 + $0x30] sm:$0xff] }
 0x22f   :  { %750 = vperm.xlu0 %1997, %v699_v56   ;;  %637 = vperm.xlu1 %1998, %v1866_v54   ;;  %v1372_v54 = vld [vmem:[#allocation10 + $0x38] sm:$0xff]  ;;  %v1386_v56 = vld [vmem:[#allocation11 + $0x28] sm:$0xff] }
 0x290   :  { %v608_v8 = vpop.permute.xlu1 %607 }
 0x291   :  { %v641_v13 = vmul.f32 %v608_v8, %v2258_v1  ;;  %v1383_v8 = vld [vmem:[#allocation11 + $0x10] sm:$0xff] }
 0x292   :  { %v603_v63 = vpop.permute.xlu0 %602 }
 0x293   :  { %v640_v10 = vmul.f32 %v603_v63, %v2256_v0  ;;  %v1613_v0 = vsel %vm757_vm3, 1.0, %v2169_v12  ;;  %v1367_v63 = vld [vmem:[#allocation10 + $0x10] sm:$0xff] }
 0x295   :  { %1868 = vmatpush3.msra.mxu1 %v640_v10  ;;  %v1382_v10 = vld [vmem:[#allocation11 + $0x8] sm:$0xff] }
 0x296   :  { %1870 = vmatmul.mubr.msk.f32.vlgmr.msra.gmra.mxu1 %vm780_vm2, %v1612_v11  ;;  %1872 = vmatprep.subr.mxu1 %v2169_v12  ;;  %v716_v61 = vpop.permute.xlu0 %715  ;;  %v613_v16 = vpop.permute.xlu1 %612  ;;  %v1366_v11 = vld [vmem:[#allocation10 + $0x8] sm:$0xff] }
 0x297   :  { %v720_v17 = vrot.slane %v716_v61, %v2423_v23  ;;  %v642_v18 = vmul.f32 %v613_v16, %v2260_v2  ;;  %1873 = vmatpush3.msra.mxu1 %v641_v13  ;;  %1874 = vmatprep.mubr.msk.f32.mxu1 %vm2170_vm0, %v2169_v12  ;;  %v1381_v13 = vld [vmem:[#allocation11] sm:$0xff] }
 0x298   :  { %1877 = vmatprep.subr.mxu1 %v2169_v12  ;;  %v1365_v61 = vld [vmem:[#allocation10] sm:$0xff] }
 0x299   :  { %vm758_vm4 = vcmp.lt.s32.totalorder %v2450_v59, %v720_v17 }
 0x29a   :  { %1875 = vmatmul.mubr.msk.f32.vlgmr.msra.gmra.mxu1 %vm780_vm2, %v1613_v0  ;;  %v723_v1 = vpop.permute.xlu0 %722  ;;  %v618_v19 = vpop.permute.xlu1 %617  ;;  %v1614_v2 = vsel %vm758_vm4, 1.0, %v2169_v12 }
 0x29b   :  { %v727_v20 = vrot.slane %v723_v1, %v2423_v23  ;;  %1878 = vmatpush3.msra.mxu1 %v642_v18  ;;  %v643_v21 = vmul.f32 %v618_v19, %v2262_v3  ;;  %1879 = vmatprep.mubr.msk.f32.mxu1 %vm2170_vm0, %v2169_v12 }
 0x29c   :  { %1882 = vmatprep.subr.mxu1 %v2169_v12 }
 0x29d   :  { %vm759_vm5 = vcmp.lt.s32.totalorder %v2450_v59, %v727_v20 }
 0x29e   :  { %v730_v22 = vpop.permute.xlu0 %729  ;;  %1880 = vmatmul.mubr.msk.f32.vlgmr.msra.gmra.mxu1 %vm780_vm2, %v1614_v2  ;;  %v623_v24 = vpop.permute.xlu1 %622  ;;  %v1615_v3 = vsel %vm759_vm5, 1.0, %v2169_v12 }
 0x29f   :  { %v734_v25 = vrot.slane %v730_v22, %v2423_v23  ;;  %1883 = vmatpush3.msra.mxu1 %v643_v21  ;;  %v644_v26 = vmul.f32 %v623_v24, %v2264_v4  ;;  %1884 = vmatprep.mubr.msk.f32.mxu1 %vm2170_vm0, %v2169_v12 }
 0x2a0   :  { %1887 = vmatprep.subr.mxu1 %v2169_v12 }
 0x2a1   :  { %vm760_vm6 = vcmp.lt.s32.totalorder %v2450_v59, %v734_v25 }
 0x2a2   :  { %v737_v27 = vpop.permute.xlu0 %736  ;;  %1885 = vmatmul.mubr.msk.f32.vlgmr.msra.gmra.mxu1 %vm780_vm2, %v1615_v3  ;;  %v628_v28 = vpop.permute.xlu1 %627  ;;  %v1616_v4 = vsel %vm760_vm6, 1.0, %v2169_v12 }
 0x2a3   :  { %v741_v29 = vrot.slane %v737_v27, %v2423_v23  ;;  %1888 = vmatpush3.msra.mxu1 %v644_v26  ;;  %v645_v30 = vmul.f32 %v628_v28, %v2266_v5  ;;  %1889 = vmatprep.mubr.msk.f32.mxu1 %vm2170_vm0, %v2169_v12 }
 0x2a4   :  { %1892 = vmatprep.subr.mxu1 %v2169_v12 }
 0x2a5   :  { %vm761_vm7 = vcmp.lt.s32.totalorder %v2450_v59, %v741_v29 }
 0x2a6   :  { %v744_v31 = vpop.permute.xlu0 %743  ;;  %1890 = vmatmul.mubr.msk.f32.vlgmr.msra.gmra.mxu1 %vm780_vm2, %v1616_v4  ;;  %v633_v32 = vpop.permute.xlu1 %632  ;;  %v1617_v5 = vsel %vm761_vm7, 1.0, %v2169_v12 }
 0x2a7   :  { %v748_v33 = vrot.slane %v744_v31, %v2423_v23  ;;  %1893 = vmatpush3.msra.mxu1 %v645_v30  ;;  %v646_v34 = vmul.f32 %v633_v32, %v2268_v6  ;;  %1894 = vmatprep.mubr.msk.f32.mxu1 %vm2170_vm0, %v2169_v12 }
 0x2a8   :  { %1897 = vmatprep.subr.mxu1 %v2169_v12 }
 0x2a9   :  { %vm762_vm8 = vcmp.lt.s32.totalorder %v2450_v59, %v748_v33 }
 0x2aa   :  { %v751_v35 = vpop.permute.xlu0 %750  ;;  %1895 = vmatmul.mubr.msk.f32.vlgmr.msra.gmra.mxu1 %vm780_vm2, %v1617_v5  ;;  %v638_v36 = vpop.permute.xlu1 %637  ;;  %v1618_v6 = vsel %vm762_vm8, 1.0, %v2169_v12 }
 0x2ab   :  { %v755_v37 = vrot.slane %v751_v35, %v2423_v23  ;;  %1898 = vmatpush3.msra.mxu1 %v646_v34  ;;  %v647_v38 = vmul.f32 %v638_v36, %v2270_v7  ;;  %1899 = vmatprep.mubr.msk.f32.mxu1 %vm2170_vm0, %v2169_v12  ;;  %v1396_v7 = vld [vmem:[#allocation11 + $0x78] sm:$0xff] }
 0x2ac   :  { %1902 = vmatprep.subr.mxu1 %v2169_v12  ;;  %1908 = vmatpush3.msra.mxu0 %v1396_v7 }
 0x2ad   :  { %vm763_vm9 = vcmp.lt.s32.totalorder %v2450_v59, %v755_v37  ;;  %1909 = vmatprep.subr.mxu0 %v2169_v12  ;;  %v1369_v59 = vld [vmem:[#allocation10 + $0x20] sm:$0xff] }
 0x2ae   :  { %1900 = vmatmul.mubr.msk.f32.vlgmr.msra.gmra.mxu1 %vm780_vm2, %v1618_v6  ;;  %v1619_v23 = vsel %vm763_vm9, 1.0, %v2169_v12  ;;  %1910 = vmatpush3.msra.mxu0 %v1395_v40 }
 0x2af   :  { %1903 = vmatpush3.msra.mxu1 %v647_v38  ;;  %1904 = vmatprep.mubr.msk.f32.mxu1 %vm2170_vm0, %v2169_v12 }
 0x2b0   :  { %1942 = vmatprep.subr.mxu1 %v2169_v12  ;;  %1911 = vmatprep.subr.mxu0 %v2169_v12 }
 0x2b1   :  { %1912 = vmatpush3.msra.mxu0 %v1394_v43 }
 0x2b2   :  { %1905 = vmatmul.mubr.msk.f32.vlgmr.msra.gmra.mxu1 %vm780_vm2, %v1619_v23  ;;  %1913 = vmatprep.subr.mxu0 %v2169_v12 }
 0x2b3   :  { %1974 = vmatprep.mubr.msk.f32.mxu1 %vm2170_vm0, %v2169_v12  ;;  %1943 = vmatpush3.msra.mxu1 %v1380_v39  ;;  %vm1494_vm0 = vcmask 1047559   ;;  %v1628_v39 = vld [vmem:[%s2562_s9] ss:$0 sm:$0xff] }
 0x2b4   :  { %1944 = vmatprep.subr.mxu1 %v2169_v12  ;;  %1914 = vmatpush3.msra.mxu0 %v1393_v45 }
 0x2b5   :  { %1945 = vmatpush3.msra.mxu1 %v1379_v41  ;;  %1915 = vmatprep.subr.mxu0 %v2169_v12 }
 0x2b6   :  { %1946 = vmatprep.subr.mxu1 %v2169_v12  ;;  %1916 = vmatpush3.msra.mxu0 %v1392_v47 }
 0x2b7   :  { %1947 = vmatpush3.msra.mxu1 %v1378_v44  ;;  %1917 = vmatprep.subr.mxu0 %v2169_v12 }
 0x2b8   :  { %1948 = vmatprep.subr.mxu1 %v2169_v12  ;;  %1918 = vmatpush3.msra.mxu0 %v1391_v49 }
 0x2b9   :  { %1949 = vmatpush3.msra.mxu1 %v1377_v46  ;;  %1919 = vmatprep.subr.mxu0 %v2169_v12 }
 0x2ba   :  { %1950 = vmatprep.subr.mxu1 %v2169_v12  ;;  %1920 = vmatpush3.msra.mxu0 %v1390_v51 }
 0x2bb   :  { %1951 = vmatpush3.msra.mxu1 %v1376_v48  ;;  %1921 = vmatprep.subr.mxu0 %v2169_v12 }
 0x2bc   :  { %1952 = vmatprep.subr.mxu1 %v2169_v12  ;;  %1922 = vmatpush3.msra.mxu0 %v1389_v53 }
 0x2bd   :  { %1953 = vmatpush3.msra.mxu1 %v1375_v50  ;;  %1923 = vmatprep.subr.mxu0 %v2169_v12 }
 0x2be   :  { %1954 = vmatprep.subr.mxu1 %v2169_v12  ;;  %1924 = vmatpush3.msra.mxu0 %v1388_v14 }
 0x2bf   :  { %1955 = vmatpush3.msra.mxu1 %v1374_v52  ;;  %1925 = vmatprep.subr.mxu0 %v2169_v12 }
 0x2c0   :  { %1956 = vmatprep.subr.mxu1 %v2169_v12  ;;  %1926 = vmatpush3.msra.mxu0 %v1387_v55 }
 0x2c1   :  { %1957 = vmatpush3.msra.mxu1 %v1373_v9  ;;  %1927 = vmatprep.subr.mxu0 %v2169_v12 }
 0x2c2   :  { %1958 = vmatprep.subr.mxu1 %v2169_v12  ;;  %1928 = vmatpush3.msra.mxu0 %v1386_v56 }
 0x2c3   :  { %1959 = vmatpush3.msra.mxu1 %v1372_v54  ;;  %1929 = vmatprep.subr.mxu0 %v2169_v12 }
 0x2c4   :  { %1960 = vmatprep.subr.mxu1 %v2169_v12  ;;  %1930 = vmatpush3.msra.mxu0 %v1385_v58 }
 0x2c5   :  { %1961 = vmatpush3.msra.mxu1 %v1371_v15  ;;  %1931 = vmatprep.subr.mxu0 %v2169_v12 }
 0x2c6   :  { %1962 = vmatprep.subr.mxu1 %v2169_v12  ;;  %1932 = vmatpush3.msra.mxu0 %v1384_v60 }
 0x2c7   :  { %1963 = vmatpush3.msra.mxu1 %v1370_v57  ;;  %1933 = vmatprep.subr.mxu0 %v2169_v12 }
 0x2c8   :  { %1964 = vmatprep.subr.mxu1 %v2169_v12  ;;  %1934 = vmatpush3.msra.mxu0 %v1383_v8 }
 0x2c9   :  { %1965 = vmatpush3.msra.mxu1 %v1369_v59  ;;  %1935 = vmatprep.subr.mxu0 %v2169_v12 }
 0x2ca   :  { %1966 = vmatprep.subr.mxu1 %v2169_v12  ;;  %1936 = vmatpush3.msra.mxu0 %v1382_v10 }
 0x2cb   :  { %1967 = vmatpush3.msra.mxu1 %v1368_v62  ;;  %1937 = vmatprep.subr.mxu0 %v2169_v12 }
 0x2cc   :  { %1968 = vmatprep.subr.mxu1 %v2169_v12  ;;  %1938 = vmatpush3.msra.mxu0 %v1381_v13 }
 0x2cd   :  { %1969 = vmatpush3.msra.mxu1 %v1367_v63  ;;  %1940 = vmatmul.mubr.f32.vlgmr.msra.gmra.mxu0 %v2336_v42 }
 0x2ce   :  { %1970 = vmatprep.subr.mxu1 %v2169_v12 }
 0x2cf   :  { %1971 = vmatpush3.msra.mxu1 %v1366_v11 }
 0x2d0   :  { %1972 = vmatprep.subr.mxu1 %v2169_v12 }
 0x2d1   :  { %1973 = vmatpush3.msra.mxu1 %v1365_v61 }
 0x356   :  { %v850_v16 = vpop.f32.mrf.mxu1 }
 0x358   :  { %v1871_v17 = vpop.f32.mrf.mxu1 }
 0x35a   :  { %v923_v18 = vpop.f32.mrf.mxu1 }
 0x35b   :  { %v1475_v25 = vrot.slane %v923_v18, 7 }
 0x35c   :  { %v1876_v0 = vpop.f32.mrf.mxu1 }
 0x35d   :  { %v1477_v28 = vsel %vm1476_vm10, %v1475_v25, %v850_v16 }
 0x35e   :  { %v996_v1 = vpop.f32.mrf.mxu1 }
 0x35f   :  { %v1478_v26 = vrot.slane %v996_v1, 6 }
 0x360   :  { %v1881_v19 = vpop.f32.mrf.mxu1 }
 0x361   :  { %v1480_v30 = vsel %vm1479_vm11, %v1478_v26, %v1477_v28 }
 0x362   :  { %v1069_v20 = vpop.f32.mrf.mxu1 }
 0x363   :  { %v1481_v12 = vrot.slane %v1069_v20, 5 }
 0x364   :  { %v1886_v21 = vpop.f32.mrf.mxu1 }
 0x365   :  { %v1483_v32 = vsel %vm1482_vm12, %v1481_v12, %v1480_v30 }
 0x366   :  { %v1142_v2 = vpop.f32.mrf.mxu1 }
 0x367   :  { %v1484_v27 = vrot.slane %v1142_v2, 4 }
 0x368   :  { %v1891_v22 = vpop.f32.mrf.mxu1 }
 0x369   :  { %v1486_v33 = vsel %vm1485_vm13, %v1484_v27, %v1483_v32 }
 0x36a   :  { %v1215_v24 = vpop.f32.mrf.mxu1 }
 0x36b   :  { %v1487_v29 = vrot.slane %v1215_v24, 3 }
 0x36c   :  { %v1896_v3 = vpop.f32.mrf.mxu1 }
 0x36d   :  { %v1489_v5 = vsel %vm1488_vm14, %v1487_v29, %v1486_v33 }
 0x36e   :  { %v1288_v42 = vpop.f32.mrf.mxu1 }
 0x36f   :  { %v1490_v4 = vrot.slane %v1288_v42, 2 }
 0x370   :  { %v1901_v31 = vpop.f32.mrf.mxu1 }
 0x371   :  { %v1492_v36 = vsel %vm1491_vm15, %v1490_v4, %v1489_v5 }
 0x372   :  { %v1361_v34 = vpop.f32.mrf.mxu1 }
 0x373   :  { %v1493_v35 = vrot.slane %v1361_v34, 1 }
 0x374   :  { %v1906_v37 = vpop.f32.mrf.mxu1 }
 0x375   :  { %v1495_v38 = vsel %vm1494_vm0, %v1493_v35, %v1492_v36 }
 0x376   :  { %1975 = vmatmul.mubr.f32.vlgmr.msra.gmra.mxu1 %v1495_v38 }
 0x38d   :  { %v1463_v6 = vpop.f32.mrf.mxu0 }
 0x38f   :  { %v1941_v23 = vpop.f32.mrf.mxu0 }
 0x436   :  { %v1563_v7 = vpop.f32.mrf.mxu1 }
 0x437   :  { %v1564_v40 = vadd.f32 %v1563_v7, %v1463_v6 }
 0x438   :  { %v1976_v41 = vpop.f32.mrf.mxu1 }
 0x439   :  { %v1574_v43 = vadd.f32 %v1628_v39, %v1564_v40 }
 0x43b   :  { %1575 = vst [vmem:[#allocation13] sm:$0xff] %v1574_v43 }
 0x43c   :  { %2135 = shalt.err (!%p2132_p2)
}
 0x43d   :  { %1585 = dma.vmem_to_hbm [thread:$0]  %s1583_s2, 128, %s2563_s10, [#allocation7]  }
 0x43e   :  { %2156 = dma.done.wait [#allocation7], 128  }
 0x43f   :  { %2157 = vsyncadd [#allocation7], 4294967168 }
 0x440   :  { %1589 = vsyncpa [#allocation6], 1 }
 0x441   :  { %1590 = vsyncpa [#allocation9], 1 }
 0x442   :  { %1591 = vsyncpa [#allocation12], 1 }
 0x443   :  { %1592 = vsyncpa [#allocation7], 1 }

</bundles_post_ra>
